<compile_context>
chip_gen: v6e
topology: v6e:2x2x1
jax: 0.10.0
libtpu: 0.0.40
codegen_flags: <defaults>
</compile_context>

<pallas_src>
import functools
import math

import jax
import jax.numpy as jnp
from jax import lax
from jax.experimental import pallas as pl
from jax.experimental.pallas import tpu as pltpu


def _round_up(x, m):
    return (x + m - 1) // m * m


def gru_pool_kernel(x_ref,     # (1, TB*Np, Cp)   one T-block of x, time-major
                    wi_ref,    # (Cp, 3*Hp)       fused input weights  [r|z|n]
                    bi_ref,    # (1, 3*Hp)        b_i (+ b_hr/b_hz folded in)
                    wh_ref,    # (Hp, 3*Hp)       fused hidden weights [r|z|n]
                    bhn_ref,   # (1, Hp)          b_hn (stays inside r*(...))
                    out_ref,   # (Np, 2*Hp)       [max | mean]  (accumulator)
                    h_scr, mx_scr, sm_scr,        # (Np, Hp) VMEM state
                    *, t_total, needs_mask):
    Np, Hp = h_scr.shape
    TB = x_ref.shape[1] // Np
    blk = pl.program_id(0)

    @pl.when(blk == 0)
    def _():
        h_scr[...] = jnp.zeros_like(h_scr)
        mx_scr[...] = jnp.full_like(mx_scr, jnp.finfo(jnp.float32).min)
        sm_scr[...] = jnp.zeros_like(sm_scr)

    # Input projection for all TB timesteps and all three gates in one MXU
    # matmul (fused into the kernel -> no (T, N, 3H) HBM intermediate).
    xp = (jnp.dot(x_ref[0], wi_ref[...], preferred_element_type=jnp.float32)
          + bi_ref[...])                               # (TB*Np, 3*Hp)

    # Loop-invariant loads / broadcasts hoisted out of the recurrence.
    wh = wh_ref[...]                                   # (Hp, 3*Hp)
    bhn = jnp.broadcast_to(bhn_ref[...], (Np, Hp))     # (Np, Hp)

    # Carry state in values: one scratch read per block, not per step.
    h = h_scr[...]
    mx = mx_scr[...]
    sm = sm_scr[...]

    t0 = blk * TB
    for t in range(TB):                                # static unroll
        xt = xp[t * Np:(t + 1) * Np, :]                # (Np, 3*Hp) sublane-aligned
        # Single fused MXU matmul for all three gates.
        hh = jnp.dot(h, wh, preferred_element_type=jnp.float32)
        r = jax.nn.sigmoid(xt[:, :Hp] + hh[:, :Hp])
        z = jax.nn.sigmoid(xt[:, Hp:2 * Hp] + hh[:, Hp:2 * Hp])
        n = jnp.tanh(xt[:, 2 * Hp:] + r * (hh[:, 2 * Hp:] + bhn))
        h_new = (1.0 - z) * n + z * h
        if needs_mask:
            # Tail block only: blend updates with a 0/1 scalar (finite mx init
            # keeps this NaN-free).
            m = ((t0 + t) < t_total).astype(jnp.float32)
            h = m * h_new + (1.0 - m) * h
            mx = m * jnp.maximum(mx, h_new) + (1.0 - m) * mx
            sm = sm + m * h_new
        else:
            h = h_new
            mx = jnp.maximum(mx, h_new)
            sm = sm + h_new

    # One scratch write per block.
    h_scr[...] = h
    mx_scr[...] = mx
    sm_scr[...] = sm

    @pl.when(blk == pl.num_programs(0) - 1)
    def _():
        out_ref[:, :Hp] = mx
        out_ref[:, Hp:] = sm * (1.0 / t_total)


def rnn_block_forward(x_nct, params, *, tb=None):
    """x_nct: (N, C, T) float32. Returns (N, 2H) float32."""
    N, C, T = x_nct.shape
    assert T >= 1, "RNNBlock requires at least one timestep"
    H = params["w_hr"].shape[0]
    f32 = jnp.float32

    Hp = _round_up(H, 128)          # lane-dense per-gate width
    Np = _round_up(N, 8)            # sublane-dense batch
    Cp = _round_up(C, 128)          # lane-dense input channels

    # T-block size: small fixed unroll inside the kernel; stream the rest of
    # the sequence over the grid.
    TB = tb if tb is not None else min(_round_up(T, 8), 16)
    Tpad = _round_up(T, TB)
    num_tb = Tpad // TB

    # (N, C, T) -> (T, N, C), zero-pad, then group into T-blocks with the
    # (TB, Np) axes merged so the in-kernel projection is a single 2-D matmul.
    x = jnp.transpose(x_nct.astype(f32), (2, 0, 1))
    x = jnp.pad(x, ((0, Tpad - T), (0, Np - N), (0, Cp - C)))
    x = x.reshape(num_tb, TB * Np, Cp)

    # Fused, gate-padded weights/biases, torch GRU gate order [r, z, n].
    def pad_w_in(w):    # (H, C) -> (Cp, Hp), transposed for x @ W
        return jnp.pad(w.astype(f32).T, ((0, Cp - C), (0, Hp - H)))

    def pad_w_h(w):     # (H, H) -> (Hp, Hp), transposed for h @ W
        return jnp.pad(w.astype(f32).T, ((0, Hp - H), (0, Hp - H)))

    def pad_b(b):       # (H,) -> (Hp,)
        return jnp.pad(b.astype(f32), (0, Hp - H))

    wi = jnp.concatenate(
        [pad_w_in(params["w_ir"]), pad_w_in(params["w_iz"]),
         pad_w_in(params["w_in"])], axis=1)                       # (Cp, 3*Hp)
    # b_hr / b_hz fold into the input bias; b_hn must stay inside r*(...).
    bi = jnp.concatenate(
        [pad_b(params["b_ir"] + params["b_hr"]),
         pad_b(params["b_iz"] + params["b_hz"]),
         pad_b(params["b_in"])])[None, :]                         # (1, 3*Hp)
    wh = jnp.concatenate(
        [pad_w_h(params["w_hr"]), pad_w_h(params["w_hz"]),
         pad_w_h(params["w_hn"])], axis=1)                        # (Hp, 3*Hp)
    bhn = pad_b(params["b_hn"])[None, :]                          # (1, Hp)

    # Tight, T-independent VMEM budget: double-buffered inputs + resident
    # output + scratch + headroom, capped well below v7x's 64 MiB.
    xblk = TB * Np * Cp * 4
    consts = (Cp * 3 * Hp + 3 * Hp + Hp * 3 * Hp + Hp) * 4
    outb = Np * 2 * Hp * 4
    scr = 3 * Np * Hp * 4
    vmem_bytes = int(min(max(2 * (xblk + consts + outb) + scr + (2 << 20),
                             4 << 20), 32 << 20))

    kernel = functools.partial(gru_pool_kernel, t_total=T,
                               needs_mask=(Tpad != T))

    out_p = pl.pallas_call(
        kernel,
        out_shape=jax.ShapeDtypeStruct((Np, 2 * Hp), f32),
        grid_spec=pltpu.PrefetchScalarGridSpec(
            num_scalar_prefetch=0,
            grid=(num_tb,),
            in_specs=[
                pl.BlockSpec((1, TB * Np, Cp), lambda t: (t, 0, 0)),
                pl.BlockSpec((Cp, 3 * Hp), lambda t: (0, 0)),
                pl.BlockSpec((1, 3 * Hp), lambda t: (0, 0)),
                pl.BlockSpec((Hp, 3 * Hp), lambda t: (0, 0)),
                pl.BlockSpec((1, Hp), lambda t: (0, 0)),
            ],
            out_specs=pl.BlockSpec((Np, 2 * Hp), lambda t: (0, 0)),
            scratch_shapes=[
                pltpu.VMEM((Np, Hp), f32),   # hidden state
                pltpu.VMEM((Np, Hp), f32),   # running max over time
                pltpu.VMEM((Np, Hp), f32),   # running sum over time
            ]),
        compiler_params=pltpu.CompilerParams(
            dimension_semantics=("arbitrary",),
            vmem_limit_bytes=vmem_bytes),
    )(x, wi, bi, wh, bhn)

    # Strip padding and concatenate [max | mean].
    return jnp.concatenate([out_p[:N, :H], out_p[:N, Hp:Hp + H]], axis=1)


def rnn_block_reference(x_nct, params):
    """Pure-JAX reference (same math as torch.nn.GRU, gate order r,z,n)."""
    x = jnp.transpose(x_nct, (2, 0, 1)).astype(jnp.float32)  # (T, N, C)
    H = params["w_hr"].shape[0]
    N = x.shape[1]

    def step(h, x_t):
        r = jax.nn.sigmoid(x_t @ params["w_ir"].T + params["b_ir"]
                           + h @ params["w_hr"].T + params["b_hr"])
        z = jax.nn.sigmoid(x_t @ params["w_iz"].T + params["b_iz"]
                           + h @ params["w_hz"].T + params["b_hz"])
        n = jnp.tanh(x_t @ params["w_in"].T + params["b_in"]
                     + r * (h @ params["w_hn"].T + params["b_hn"]))
        h_new = (1.0 - z) * n + z * h
        return h_new, h_new

    h0 = jnp.zeros((N, H), jnp.float32)
    _, hs = lax.scan(step, h0, x)                 # (T, N, H)
    return jnp.concatenate([hs.max(0), hs.mean(0)], axis=1)


def init_gru_params(key, in_ch, rnn_ch):
    """Deterministic init matching torch.nn.GRU shapes (uniform +-1/sqrt(H))."""
    k = 1.0 / math.sqrt(rnn_ch)
    keys = jax.random.split(key, 10)
    u = lambda kk, shape: jax.random.uniform(kk, shape, jnp.float32, -k, k)
    return {
        "w_ir": u(keys[0], (rnn_ch, in_ch)),
        "w_iz": u(keys[1], (rnn_ch, in_ch)),
        "w_in": u(keys[2], (rnn_ch, in_ch)),
        "w_hr": u(keys[3], (rnn_ch, rnn_ch)),
        "w_hz": u(keys[4], (rnn_ch, rnn_ch)),
        "w_hn": u(keys[5], (rnn_ch, rnn_ch)),
        "b_ir": u(keys[6], (rnn_ch,)),
        "b_iz": u(keys[7], (rnn_ch,)),
        "b_in": u(keys[8], (rnn_ch,)),
        "b_hr": u(keys[9], (rnn_ch,)),
        "b_hz": u(jax.random.fold_in(key, 100), (rnn_ch,)),
        "b_hn": u(jax.random.fold_in(key, 101), (rnn_ch,)),
    }


if __name__ == "__main__":
    # Small shapes implied by the forward: x is (batch, in_ch, seq_len).
    N, C, T, H = 2, 4, 8, 32

    key = jax.random.PRNGKey(0)
    kx, kp = jax.random.split(key)
    x = jax.random.normal(kx, (N, C, T), jnp.float32)
    params = init_gru_params(kp, C, H)

    out = jax.block_until_ready(rnn_block_forward(x, params))
    ref = jax.block_until_ready(rnn_block_reference(x, params))

    assert out.shape == (N, 2 * H), out.shape
    assert jnp.allclose(out, ref, rtol=1e-5, atol=1e-5), (
        float(jnp.max(jnp.abs(out - ref))))
    print("KERNEL_OK")
</pallas_src>

<mosaic_0001>
module attributes {stable_mosaic.version = 11 : i64} {
  func.func @gru_pool_kernel(%arg0: i32, %arg1: memref<1x64x128xf32, #tpu.memory_space<vmem>>, %arg2: memref<128x384xf32, #tpu.memory_space<vmem>>, %arg3: memref<1x384xf32, #tpu.memory_space<vmem>>, %arg4: memref<128x384xf32, #tpu.memory_space<vmem>>, %arg5: memref<1x128xf32, #tpu.memory_space<vmem>>, %arg6: memref<8x256xf32, #tpu.memory_space<vmem>>, %arg7: memref<8x128xf32, #tpu.memory_space<vmem>>, %arg8: memref<8x128xf32, #tpu.memory_space<vmem>>, %arg9: memref<8x128xf32, #tpu.memory_space<vmem>>) attributes {dimension_semantics = [#tpu.dimension_semantics<arbitrary>], iteration_bounds = array<i64: 1>, scalar_prefetch = 0 : i64, scratch_operands = 3 : i64, tpu.core_type = #tpu.core_type<tc>, window_params = [{transform_indices = @transform_0, window_bounds = array<i64: 1, 64, 128>}, {pipeline_mode = #tpu.pipeline_mode<synchronous>, transform_indices = @transform_1, window_bounds = array<i64: 128, 384>}, {pipeline_mode = #tpu.pipeline_mode<synchronous>, transform_indices = @transform_2, window_bounds = array<i64: 1, 384>}, {pipeline_mode = #tpu.pipeline_mode<synchronous>, transform_indices = @transform_3, window_bounds = array<i64: 128, 384>}, {pipeline_mode = #tpu.pipeline_mode<synchronous>, transform_indices = @transform_4, window_bounds = array<i64: 1, 128>}, {pipeline_mode = #tpu.pipeline_mode<synchronous>, transform_indices = @transform_5, window_bounds = array<i64: 8, 256>}]} {
    %c0_i32 = arith.constant 0 : i32
    %0 = arith.cmpi eq, %arg0, %c0_i32 : i32
    %1 = arith.extui %0 : i1 to i32
    %c0_i32_0 = arith.constant 0 : i32
    %2 = arith.cmpi ne, %1, %c0_i32_0 : i32
    scf.if %2 {
      %cst_57 = arith.constant 0.000000e+00 : f32
      %271 = vector.broadcast %cst_57 : f32 to vector<8x128xf32>
      %c0_58 = arith.constant 0 : index
      %c0_59 = arith.constant 0 : index
      %272 = vector.load %arg7[%c0_58, %c0_59] : memref<8x128xf32, #tpu.memory_space<vmem>>, vector<8x128xf32>
      tpu.vector_store %arg7[%c0_58, %c0_59], %271 {strides = array<i32>} : memref<8x128xf32, #tpu.memory_space<vmem>>, vector<8x128xf32>,
      %cst_60 = arith.constant -3.40282347E+38 : f32
      %273 = vector.broadcast %cst_60 : f32 to vector<8x128xf32>
      %c0_61 = arith.constant 0 : index
      %c0_62 = arith.constant 0 : index
      %274 = vector.load %arg8[%c0_61, %c0_62] : memref<8x128xf32, #tpu.memory_space<vmem>>, vector<8x128xf32>
      tpu.vector_store %arg8[%c0_61, %c0_62], %273 {strides = array<i32>} : memref<8x128xf32, #tpu.memory_space<vmem>>, vector<8x128xf32>,
      %cst_63 = arith.constant 0.000000e+00 : f32
      %275 = vector.broadcast %cst_63 : f32 to vector<8x128xf32>
      %c0_64 = arith.constant 0 : index
      %c0_65 = arith.constant 0 : index
      %276 = vector.load %arg9[%c0_64, %c0_65] : memref<8x128xf32, #tpu.memory_space<vmem>>, vector<8x128xf32>
      tpu.vector_store %arg9[%c0_64, %c0_65], %275 {strides = array<i32>} : memref<8x128xf32, #tpu.memory_space<vmem>>, vector<8x128xf32>,
    } else {
    }
    %c0 = arith.constant 0 : index
    %c0_1 = arith.constant 0 : index
    %c0_2 = arith.constant 0 : index
    %3 = vector.load %arg1[%c0, %c0_1, %c0_2] : memref<1x64x128xf32, #tpu.memory_space<vmem>>, vector<1x64x128xf32>
    %4 = vector.shape_cast %3 : vector<1x64x128xf32> to vector<64x128xf32>
    %c0_3 = arith.constant 0 : index
    %c0_4 = arith.constant 0 : index
    %5 = vector.load %arg2[%c0_3, %c0_4] : memref<128x384xf32, #tpu.memory_space<vmem>>, vector<128x384xf32>
    %cst = arith.constant dense<0.000000e+00> : vector<64x384xf32>
    %6 = tpu.matmul %4, %5, %cst {dimension_numbers = #tpu.dot_dimension_numbers<[1], [0], [0], [1], [0, 0, 1, 1], [], []>} : vector<64x128xf32>, vector<128x384xf32>, vector<64x384xf32> -> vector<64x384xf32>
    %c0_5 = arith.constant 0 : index
    %c0_6 = arith.constant 0 : index
    %7 = vector.load %arg3[%c0_5, %c0_6] : memref<1x384xf32, #tpu.memory_space<vmem>>, vector<1x384xf32>
    %8 = vector.broadcast %7 : vector<1x384xf32> to vector<64x384xf32>
    %9 = arith.addf %6, %8 : vector<64x384xf32>
    %c0_7 = arith.constant 0 : index
    %c0_8 = arith.constant 0 : index
    %10 = vector.load %arg4[%c0_7, %c0_8] : memref<128x384xf32, #tpu.memory_space<vmem>>, vector<128x384xf32>
    %c0_9 = arith.constant 0 : index
    %c0_10 = arith.constant 0 : index
    %11 = vector.load %arg5[%c0_9, %c0_10] : memref<1x128xf32, #tpu.memory_space<vmem>>, vector<1x128xf32>
    %12 = vector.shape_cast %11 : vector<1x128xf32> to vector<1x128xf32>
    %13 = vector.broadcast %12 : vector<1x128xf32> to vector<8x128xf32>
    %c0_11 = arith.constant 0 : index
    %c0_12 = arith.constant 0 : index
    %14 = vector.load %arg7[%c0_11, %c0_12] : memref<8x128xf32, #tpu.memory_space<vmem>>, vector<8x128xf32>
    %c0_13 = arith.constant 0 : index
    %c0_14 = arith.constant 0 : index
    %15 = vector.load %arg8[%c0_13, %c0_14] : memref<8x128xf32, #tpu.memory_space<vmem>>, vector<8x128xf32>
    %c0_15 = arith.constant 0 : index
    %c0_16 = arith.constant 0 : index
    %16 = vector.load %arg9[%c0_15, %c0_16] : memref<8x128xf32, #tpu.memory_space<vmem>>, vector<8x128xf32>
    %17 = vector.extract_strided_slice %9 {offsets = [0, 0], sizes = [8, 384], strides = [1, 1]} : vector<64x384xf32> to vector<8x384xf32>
    %cst_17 = arith.constant dense<0.000000e+00> : vector<8x384xf32>
    %18 = tpu.matmul %14, %10, %cst_17 {dimension_numbers = #tpu.dot_dimension_numbers<[1], [0], [0], [1], [0, 0, 1, 1], [], []>} : vector<8x128xf32>, vector<128x384xf32>, vector<8x384xf32> -> vector<8x384xf32>
    %19 = vector.extract_strided_slice %17 {offsets = [0, 0], sizes = [8, 128], strides = [1, 1]} : vector<8x384xf32> to vector<8x128xf32>
    %20 = vector.extract_strided_slice %18 {offsets = [0, 0], sizes = [8, 128], strides = [1, 1]} : vector<8x384xf32> to vector<8x128xf32>
    %21 = arith.addf %19, %20 : vector<8x128xf32>
    %22 = arith.negf %21 : vector<8x128xf32>
    %23 = math.exp %22 : vector<8x128xf32>
    %cst_18 = arith.constant 1.000000e+00 : f32
    %24 = vector.broadcast %cst_18 : f32 to vector<8x128xf32>
    %25 = arith.addf %24, %23 : vector<8x128xf32>
    %26 = arith.divf %24, %25 : vector<8x128xf32>
    %27 = vector.extract_strided_slice %17 {offsets = [0, 128], sizes = [8, 128], strides = [1, 1]} : vector<8x384xf32> to vector<8x128xf32>
    %28 = vector.extract_strided_slice %18 {offsets = [0, 128], sizes = [8, 128], strides = [1, 1]} : vector<8x384xf32> to vector<8x128xf32>
    %29 = arith.addf %27, %28 : vector<8x128xf32>
    %30 = arith.negf %29 : vector<8x128xf32>
    %31 = math.exp %30 : vector<8x128xf32>
    %cst_19 = arith.constant 1.000000e+00 : f32
    %32 = vector.broadcast %cst_19 : f32 to vector<8x128xf32>
    %33 = arith.addf %32, %31 : vector<8x128xf32>
    %34 = arith.divf %32, %33 : vector<8x128xf32>
    %35 = vector.extract_strided_slice %17 {offsets = [0, 256], sizes = [8, 128], strides = [1, 1]} : vector<8x384xf32> to vector<8x128xf32>
    %36 = vector.extract_strided_slice %18 {offsets = [0, 256], sizes = [8, 128], strides = [1, 1]} : vector<8x384xf32> to vector<8x128xf32>
    %37 = arith.addf %36, %13 : vector<8x128xf32>
    %38 = arith.mulf %26, %37 : vector<8x128xf32>
    %39 = arith.addf %35, %38 : vector<8x128xf32>
    %40 = math.tanh %39 : vector<8x128xf32>
    %cst_20 = arith.constant 1.000000e+00 : f32
    %41 = vector.broadcast %cst_20 : f32 to vector<8x128xf32>
    %42 = arith.subf %41, %34 : vector<8x128xf32>
    %43 = arith.mulf %42, %40 : vector<8x128xf32>
    %44 = arith.mulf %34, %14 : vector<8x128xf32>
    %45 = arith.addf %43, %44 : vector<8x128xf32>
    %46 = arith.maximumf %15, %45 : vector<8x128xf32>
    %47 = arith.addf %16, %45 : vector<8x128xf32>
    %48 = vector.extract_strided_slice %9 {offsets = [8, 0], sizes = [8, 384], strides = [1, 1]} : vector<64x384xf32> to vector<8x384xf32>
    %cst_21 = arith.constant dense<0.000000e+00> : vector<8x384xf32>
    %49 = tpu.matmul %45, %10, %cst_21 {dimension_numbers = #tpu.dot_dimension_numbers<[1], [0], [0], [1], [0, 0, 1, 1], [], []>} : vector<8x128xf32>, vector<128x384xf32>, vector<8x384xf32> -> vector<8x384xf32>
    %50 = vector.extract_strided_slice %48 {offsets = [0, 0], sizes = [8, 128], strides = [1, 1]} : vector<8x384xf32> to vector<8x128xf32>
    %51 = vector.extract_strided_slice %49 {offsets = [0, 0], sizes = [8, 128], strides = [1, 1]} : vector<8x384xf32> to vector<8x128xf32>
    %52 = arith.addf %50, %51 : vector<8x128xf32>
    %53 = arith.negf %52 : vector<8x128xf32>
    %54 = math.exp %53 : vector<8x128xf32>
    %cst_22 = arith.constant 1.000000e+00 : f32
    %55 = vector.broadcast %cst_22 : f32 to vector<8x128xf32>
    %56 = arith.addf %55, %54 : vector<8x128xf32>
    %57 = arith.divf %55, %56 : vector<8x128xf32>
    %58 = vector.extract_strided_slice %48 {offsets = [0, 128], sizes = [8, 128], strides = [1, 1]} : vector<8x384xf32> to vector<8x128xf32>
    %59 = vector.extract_strided_slice %49 {offsets = [0, 128], sizes = [8, 128], strides = [1, 1]} : vector<8x384xf32> to vector<8x128xf32>
    %60 = arith.addf %58, %59 : vector<8x128xf32>
    %61 = arith.negf %60 : vector<8x128xf32>
    %62 = math.exp %61 : vector<8x128xf32>
    %cst_23 = arith.constant 1.000000e+00 : f32
    %63 = vector.broadcast %cst_23 : f32 to vector<8x128xf32>
    %64 = arith.addf %63, %62 : vector<8x128xf32>
    %65 = arith.divf %63, %64 : vector<8x128xf32>
    %66 = vector.extract_strided_slice %48 {offsets = [0, 256], sizes = [8, 128], strides = [1, 1]} : vector<8x384xf32> to vector<8x128xf32>
    %67 = vector.extract_strided_slice %49 {offsets = [0, 256], sizes = [8, 128], strides = [1, 1]} : vector<8x384xf32> to vector<8x128xf32>
    %68 = arith.addf %67, %13 : vector<8x128xf32>
    %69 = arith.mulf %57, %68 : vector<8x128xf32>
    %70 = arith.addf %66, %69 : vector<8x128xf32>
    %71 = math.tanh %70 : vector<8x128xf32>
    %cst_24 = arith.constant 1.000000e+00 : f32
    %72 = vector.broadcast %cst_24 : f32 to vector<8x128xf32>
    %73 = arith.subf %72, %65 : vector<8x128xf32>
    %74 = arith.mulf %73, %71 : vector<8x128xf32>
    %75 = arith.mulf %65, %45 : vector<8x128xf32>
    %76 = arith.addf %74, %75 : vector<8x128xf32>
    %77 = arith.maximumf %46, %76 : vector<8x128xf32>
    %78 = arith.addf %47, %76 : vector<8x128xf32>
    %79 = vector.extract_strided_slice %9 {offsets = [16, 0], sizes = [8, 384], strides = [1, 1]} : vector<64x384xf32> to vector<8x384xf32>
    %cst_25 = arith.constant dense<0.000000e+00> : vector<8x384xf32>
    %80 = tpu.matmul %76, %10, %cst_25 {dimension_numbers = #tpu.dot_dimension_numbers<[1], [0], [0], [1], [0, 0, 1, 1], [], []>} : vector<8x128xf32>, vector<128x384xf32>, vector<8x384xf32> -> vector<8x384xf32>
    %81 = vector.extract_strided_slice %79 {offsets = [0, 0], sizes = [8, 128], strides = [1, 1]} : vector<8x384xf32> to vector<8x128xf32>
    %82 = vector.extract_strided_slice %80 {offsets = [0, 0], sizes = [8, 128], strides = [1, 1]} : vector<8x384xf32> to vector<8x128xf32>
    %83 = arith.addf %81, %82 : vector<8x128xf32>
    %84 = arith.negf %83 : vector<8x128xf32>
    %85 = math.exp %84 : vector<8x128xf32>
    %cst_26 = arith.constant 1.000000e+00 : f32
    %86 = vector.broadcast %cst_26 : f32 to vector<8x128xf32>
    %87 = arith.addf %86, %85 : vector<8x128xf32>
    %88 = arith.divf %86, %87 : vector<8x128xf32>
    %89 = vector.extract_strided_slice %79 {offsets = [0, 128], sizes = [8, 128], strides = [1, 1]} : vector<8x384xf32> to vector<8x128xf32>
    %90 = vector.extract_strided_slice %80 {offsets = [0, 128], sizes = [8, 128], strides = [1, 1]} : vector<8x384xf32> to vector<8x128xf32>
    %91 = arith.addf %89, %90 : vector<8x128xf32>
    %92 = arith.negf %91 : vector<8x128xf32>
    %93 = math.exp %92 : vector<8x128xf32>
    %cst_27 = arith.constant 1.000000e+00 : f32
    %94 = vector.broadcast %cst_27 : f32 to vector<8x128xf32>
    %95 = arith.addf %94, %93 : vector<8x128xf32>
    %96 = arith.divf %94, %95 : vector<8x128xf32>
    %97 = vector.extract_strided_slice %79 {offsets = [0, 256], sizes = [8, 128], strides = [1, 1]} : vector<8x384xf32> to vector<8x128xf32>
    %98 = vector.extract_strided_slice %80 {offsets = [0, 256], sizes = [8, 128], strides = [1, 1]} : vector<8x384xf32> to vector<8x128xf32>
    %99 = arith.addf %98, %13 : vector<8x128xf32>
    %100 = arith.mulf %88, %99 : vector<8x128xf32>
    %101 = arith.addf %97, %100 : vector<8x128xf32>
    %102 = math.tanh %101 : vector<8x128xf32>
    %cst_28 = arith.constant 1.000000e+00 : f32
    %103 = vector.broadcast %cst_28 : f32 to vector<8x128xf32>
    %104 = arith.subf %103, %96 : vector<8x128xf32>
    %105 = arith.mulf %104, %102 : vector<8x128xf32>
    %106 = arith.mulf %96, %76 : vector<8x128xf32>
    %107 = arith.addf %105, %106 : vector<8x128xf32>
    %108 = arith.maximumf %77, %107 : vector<8x128xf32>
    %109 = arith.addf %78, %107 : vector<8x128xf32>
    %110 = vector.extract_strided_slice %9 {offsets = [24, 0], sizes = [8, 384], strides = [1, 1]} : vector<64x384xf32> to vector<8x384xf32>
    %cst_29 = arith.constant dense<0.000000e+00> : vector<8x384xf32>
    %111 = tpu.matmul %107, %10, %cst_29 {dimension_numbers = #tpu.dot_dimension_numbers<[1], [0], [0], [1], [0, 0, 1, 1], [], []>} : vector<8x128xf32>, vector<128x384xf32>, vector<8x384xf32> -> vector<8x384xf32>
    %112 = vector.extract_strided_slice %110 {offsets = [0, 0], sizes = [8, 128], strides = [1, 1]} : vector<8x384xf32> to vector<8x128xf32>
    %113 = vector.extract_strided_slice %111 {offsets = [0, 0], sizes = [8, 128], strides = [1, 1]} : vector<8x384xf32> to vector<8x128xf32>
    %114 = arith.addf %112, %113 : vector<8x128xf32>
    %115 = arith.negf %114 : vector<8x128xf32>
    %116 = math.exp %115 : vector<8x128xf32>
    %cst_30 = arith.constant 1.000000e+00 : f32
    %117 = vector.broadcast %cst_30 : f32 to vector<8x128xf32>
    %118 = arith.addf %117, %116 : vector<8x128xf32>
    %119 = arith.divf %117, %118 : vector<8x128xf32>
    %120 = vector.extract_strided_slice %110 {offsets = [0, 128], sizes = [8, 128], strides = [1, 1]} : vector<8x384xf32> to vector<8x128xf32>
    %121 = vector.extract_strided_slice %111 {offsets = [0, 128], sizes = [8, 128], strides = [1, 1]} : vector<8x384xf32> to vector<8x128xf32>
    %122 = arith.addf %120, %121 : vector<8x128xf32>
    %123 = arith.negf %122 : vector<8x128xf32>
    %124 = math.exp %123 : vector<8x128xf32>
    %cst_31 = arith.constant 1.000000e+00 : f32
    %125 = vector.broadcast %cst_31 : f32 to vector<8x128xf32>
    %126 = arith.addf %125, %124 : vector<8x128xf32>
    %127 = arith.divf %125, %126 : vector<8x128xf32>
    %128 = vector.extract_strided_slice %110 {offsets = [0, 256], sizes = [8, 128], strides = [1, 1]} : vector<8x384xf32> to vector<8x128xf32>
    %129 = vector.extract_strided_slice %111 {offsets = [0, 256], sizes = [8, 128], strides = [1, 1]} : vector<8x384xf32> to vector<8x128xf32>
    %130 = arith.addf %129, %13 : vector<8x128xf32>
    %131 = arith.mulf %119, %130 : vector<8x128xf32>
    %132 = arith.addf %128, %131 : vector<8x128xf32>
    %133 = math.tanh %132 : vector<8x128xf32>
    %cst_32 = arith.constant 1.000000e+00 : f32
    %134 = vector.broadcast %cst_32 : f32 to vector<8x128xf32>
    %135 = arith.subf %134, %127 : vector<8x128xf32>
    %136 = arith.mulf %135, %133 : vector<8x128xf32>
    %137 = arith.mulf %127, %107 : vector<8x128xf32>
    %138 = arith.addf %136, %137 : vector<8x128xf32>
    %139 = arith.maximumf %108, %138 : vector<8x128xf32>
    %140 = arith.addf %109, %138 : vector<8x128xf32>
    %141 = vector.extract_strided_slice %9 {offsets = [32, 0], sizes = [8, 384], strides = [1, 1]} : vector<64x384xf32> to vector<8x384xf32>
    %cst_33 = arith.constant dense<0.000000e+00> : vector<8x384xf32>
    %142 = tpu.matmul %138, %10, %cst_33 {dimension_numbers = #tpu.dot_dimension_numbers<[1], [0], [0], [1], [0, 0, 1, 1], [], []>} : vector<8x128xf32>, vector<128x384xf32>, vector<8x384xf32> -> vector<8x384xf32>
    %143 = vector.extract_strided_slice %141 {offsets = [0, 0], sizes = [8, 128], strides = [1, 1]} : vector<8x384xf32> to vector<8x128xf32>
    %144 = vector.extract_strided_slice %142 {offsets = [0, 0], sizes = [8, 128], strides = [1, 1]} : vector<8x384xf32> to vector<8x128xf32>
    %145 = arith.addf %143, %144 : vector<8x128xf32>
    %146 = arith.negf %145 : vector<8x128xf32>
    %147 = math.exp %146 : vector<8x128xf32>
    %cst_34 = arith.constant 1.000000e+00 : f32
    %148 = vector.broadcast %cst_34 : f32 to vector<8x128xf32>
    %149 = arith.addf %148, %147 : vector<8x128xf32>
    %150 = arith.divf %148, %149 : vector<8x128xf32>
    %151 = vector.extract_strided_slice %141 {offsets = [0, 128], sizes = [8, 128], strides = [1, 1]} : vector<8x384xf32> to vector<8x128xf32>
    %152 = vector.extract_strided_slice %142 {offsets = [0, 128], sizes = [8, 128], strides = [1, 1]} : vector<8x384xf32> to vector<8x128xf32>
    %153 = arith.addf %151, %152 : vector<8x128xf32>
    %154 = arith.negf %153 : vector<8x128xf32>
    %155 = math.exp %154 : vector<8x128xf32>
    %cst_35 = arith.constant 1.000000e+00 : f32
    %156 = vector.broadcast %cst_35 : f32 to vector<8x128xf32>
    %157 = arith.addf %156, %155 : vector<8x128xf32>
    %158 = arith.divf %156, %157 : vector<8x128xf32>
    %159 = vector.extract_strided_slice %141 {offsets = [0, 256], sizes = [8, 128], strides = [1, 1]} : vector<8x384xf32> to vector<8x128xf32>
    %160 = vector.extract_strided_slice %142 {offsets = [0, 256], sizes = [8, 128], strides = [1, 1]} : vector<8x384xf32> to vector<8x128xf32>
    %161 = arith.addf %160, %13 : vector<8x128xf32>
    %162 = arith.mulf %150, %161 : vector<8x128xf32>
    %163 = arith.addf %159, %162 : vector<8x128xf32>
    %164 = math.tanh %163 : vector<8x128xf32>
    %cst_36 = arith.constant 1.000000e+00 : f32
    %165 = vector.broadcast %cst_36 : f32 to vector<8x128xf32>
    %166 = arith.subf %165, %158 : vector<8x128xf32>
    %167 = arith.mulf %166, %164 : vector<8x128xf32>
    %168 = arith.mulf %158, %138 : vector<8x128xf32>
    %169 = arith.addf %167, %168 : vector<8x128xf32>
    %170 = arith.maximumf %139, %169 : vector<8x128xf32>
    %171 = arith.addf %140, %169 : vector<8x128xf32>
    %172 = vector.extract_strided_slice %9 {offsets = [40, 0], sizes = [8, 384], strides = [1, 1]} : vector<64x384xf32> to vector<8x384xf32>
    %cst_37 = arith.constant dense<0.000000e+00> : vector<8x384xf32>
    %173 = tpu.matmul %169, %10, %cst_37 {dimension_numbers = #tpu.dot_dimension_numbers<[1], [0], [0], [1], [0, 0, 1, 1], [], []>} : vector<8x128xf32>, vector<128x384xf32>, vector<8x384xf32> -> vector<8x384xf32>
    %174 = vector.extract_strided_slice %172 {offsets = [0, 0], sizes = [8, 128], strides = [1, 1]} : vector<8x384xf32> to vector<8x128xf32>
    %175 = vector.extract_strided_slice %173 {offsets = [0, 0], sizes = [8, 128], strides = [1, 1]} : vector<8x384xf32> to vector<8x128xf32>
    %176 = arith.addf %174, %175 : vector<8x128xf32>
    %177 = arith.negf %176 : vector<8x128xf32>
    %178 = math.exp %177 : vector<8x128xf32>
    %cst_38 = arith.constant 1.000000e+00 : f32
    %179 = vector.broadcast %cst_38 : f32 to vector<8x128xf32>
    %180 = arith.addf %179, %178 : vector<8x128xf32>
    %181 = arith.divf %179, %180 : vector<8x128xf32>
    %182 = vector.extract_strided_slice %172 {offsets = [0, 128], sizes = [8, 128], strides = [1, 1]} : vector<8x384xf32> to vector<8x128xf32>
    %183 = vector.extract_strided_slice %173 {offsets = [0, 128], sizes = [8, 128], strides = [1, 1]} : vector<8x384xf32> to vector<8x128xf32>
    %184 = arith.addf %182, %183 : vector<8x128xf32>
    %185 = arith.negf %184 : vector<8x128xf32>
    %186 = math.exp %185 : vector<8x128xf32>
    %cst_39 = arith.constant 1.000000e+00 : f32
    %187 = vector.broadcast %cst_39 : f32 to vector<8x128xf32>
    %188 = arith.addf %187, %186 : vector<8x128xf32>
    %189 = arith.divf %187, %188 : vector<8x128xf32>
    %190 = vector.extract_strided_slice %172 {offsets = [0, 256], sizes = [8, 128], strides = [1, 1]} : vector<8x384xf32> to vector<8x128xf32>
    %191 = vector.extract_strided_slice %173 {offsets = [0, 256], sizes = [8, 128], strides = [1, 1]} : vector<8x384xf32> to vector<8x128xf32>
    %192 = arith.addf %191, %13 : vector<8x128xf32>
    %193 = arith.mulf %181, %192 : vector<8x128xf32>
    %194 = arith.addf %190, %193 : vector<8x128xf32>
    %195 = math.tanh %194 : vector<8x128xf32>
    %cst_40 = arith.constant 1.000000e+00 : f32
    %196 = vector.broadcast %cst_40 : f32 to vector<8x128xf32>
    %197 = arith.subf %196, %189 : vector<8x128xf32>
    %198 = arith.mulf %197, %195 : vector<8x128xf32>
    %199 = arith.mulf %189, %169 : vector<8x128xf32>
    %200 = arith.addf %198, %199 : vector<8x128xf32>
    %201 = arith.maximumf %170, %200 : vector<8x128xf32>
    %202 = arith.addf %171, %200 : vector<8x128xf32>
    %203 = vector.extract_strided_slice %9 {offsets = [48, 0], sizes = [8, 384], strides = [1, 1]} : vector<64x384xf32> to vector<8x384xf32>
    %cst_41 = arith.constant dense<0.000000e+00> : vector<8x384xf32>
    %204 = tpu.matmul %200, %10, %cst_41 {dimension_numbers = #tpu.dot_dimension_numbers<[1], [0], [0], [1], [0, 0, 1, 1], [], []>} : vector<8x128xf32>, vector<128x384xf32>, vector<8x384xf32> -> vector<8x384xf32>
    %205 = vector.extract_strided_slice %203 {offsets = [0, 0], sizes = [8, 128], strides = [1, 1]} : vector<8x384xf32> to vector<8x128xf32>
    %206 = vector.extract_strided_slice %204 {offsets = [0, 0], sizes = [8, 128], strides = [1, 1]} : vector<8x384xf32> to vector<8x128xf32>
    %207 = arith.addf %205, %206 : vector<8x128xf32>
    %208 = arith.negf %207 : vector<8x128xf32>
    %209 = math.exp %208 : vector<8x128xf32>
    %cst_42 = arith.constant 1.000000e+00 : f32
    %210 = vector.broadcast %cst_42 : f32 to vector<8x128xf32>
    %211 = arith.addf %210, %209 : vector<8x128xf32>
    %212 = arith.divf %210, %211 : vector<8x128xf32>
    %213 = vector.extract_strided_slice %203 {offsets = [0, 128], sizes = [8, 128], strides = [1, 1]} : vector<8x384xf32> to vector<8x128xf32>
    %214 = vector.extract_strided_slice %204 {offsets = [0, 128], sizes = [8, 128], strides = [1, 1]} : vector<8x384xf32> to vector<8x128xf32>
    %215 = arith.addf %213, %214 : vector<8x128xf32>
    %216 = arith.negf %215 : vector<8x128xf32>
    %217 = math.exp %216 : vector<8x128xf32>
    %cst_43 = arith.constant 1.000000e+00 : f32
    %218 = vector.broadcast %cst_43 : f32 to vector<8x128xf32>
    %219 = arith.addf %218, %217 : vector<8x128xf32>
    %220 = arith.divf %218, %219 : vector<8x128xf32>
    %221 = vector.extract_strided_slice %203 {offsets = [0, 256], sizes = [8, 128], strides = [1, 1]} : vector<8x384xf32> to vector<8x128xf32>
    %222 = vector.extract_strided_slice %204 {offsets = [0, 256], sizes = [8, 128], strides = [1, 1]} : vector<8x384xf32> to vector<8x128xf32>
    %223 = arith.addf %222, %13 : vector<8x128xf32>
    %224 = arith.mulf %212, %223 : vector<8x128xf32>
    %225 = arith.addf %221, %224 : vector<8x128xf32>
    %226 = math.tanh %225 : vector<8x128xf32>
    %cst_44 = arith.constant 1.000000e+00 : f32
    %227 = vector.broadcast %cst_44 : f32 to vector<8x128xf32>
    %228 = arith.subf %227, %220 : vector<8x128xf32>
    %229 = arith.mulf %228, %226 : vector<8x128xf32>
    %230 = arith.mulf %220, %200 : vector<8x128xf32>
    %231 = arith.addf %229, %230 : vector<8x128xf32>
    %232 = arith.maximumf %201, %231 : vector<8x128xf32>
    %233 = arith.addf %202, %231 : vector<8x128xf32>
    %234 = vector.extract_strided_slice %9 {offsets = [56, 0], sizes = [8, 384], strides = [1, 1]} : vector<64x384xf32> to vector<8x384xf32>
    %cst_45 = arith.constant dense<0.000000e+00> : vector<8x384xf32>
    %235 = tpu.matmul %231, %10, %cst_45 {dimension_numbers = #tpu.dot_dimension_numbers<[1], [0], [0], [1], [0, 0, 1, 1], [], []>} : vector<8x128xf32>, vector<128x384xf32>, vector<8x384xf32> -> vector<8x384xf32>
    %236 = vector.extract_strided_slice %234 {offsets = [0, 0], sizes = [8, 128], strides = [1, 1]} : vector<8x384xf32> to vector<8x128xf32>
    %237 = vector.extract_strided_slice %235 {offsets = [0, 0], sizes = [8, 128], strides = [1, 1]} : vector<8x384xf32> to vector<8x128xf32>
    %238 = arith.addf %236, %237 : vector<8x128xf32>
    %239 = arith.negf %238 : vector<8x128xf32>
    %240 = math.exp %239 : vector<8x128xf32>
    %cst_46 = arith.constant 1.000000e+00 : f32
    %241 = vector.broadcast %cst_46 : f32 to vector<8x128xf32>
    %242 = arith.addf %241, %240 : vector<8x128xf32>
    %243 = arith.divf %241, %242 : vector<8x128xf32>
    %244 = vector.extract_strided_slice %234 {offsets = [0, 128], sizes = [8, 128], strides = [1, 1]} : vector<8x384xf32> to vector<8x128xf32>
    %245 = vector.extract_strided_slice %235 {offsets = [0, 128], sizes = [8, 128], strides = [1, 1]} : vector<8x384xf32> to vector<8x128xf32>
    %246 = arith.addf %244, %245 : vector<8x128xf32>
    %247 = arith.negf %246 : vector<8x128xf32>
    %248 = math.exp %247 : vector<8x128xf32>
    %cst_47 = arith.constant 1.000000e+00 : f32
    %249 = vector.broadcast %cst_47 : f32 to vector<8x128xf32>
    %250 = arith.addf %249, %248 : vector<8x128xf32>
    %251 = arith.divf %249, %250 : vector<8x128xf32>
    %252 = vector.extract_strided_slice %234 {offsets = [0, 256], sizes = [8, 128], strides = [1, 1]} : vector<8x384xf32> to vector<8x128xf32>
    %253 = vector.extract_strided_slice %235 {offsets = [0, 256], sizes = [8, 128], strides = [1, 1]} : vector<8x384xf32> to vector<8x128xf32>
    %254 = arith.addf %253, %13 : vector<8x128xf32>
    %255 = arith.mulf %243, %254 : vector<8x128xf32>
    %256 = arith.addf %252, %255 : vector<8x128xf32>
    %257 = math.tanh %256 : vector<8x128xf32>
    %cst_48 = arith.constant 1.000000e+00 : f32
    %258 = vector.broadcast %cst_48 : f32 to vector<8x128xf32>
    %259 = arith.subf %258, %251 : vector<8x128xf32>
    %260 = arith.mulf %259, %257 : vector<8x128xf32>
    %261 = arith.mulf %251, %231 : vector<8x128xf32>
    %262 = arith.addf %260, %261 : vector<8x128xf32>
    %263 = arith.maximumf %232, %262 : vector<8x128xf32>
    %264 = arith.addf %233, %262 : vector<8x128xf32>
    %c0_49 = arith.constant 0 : index
    %c0_50 = arith.constant 0 : index
    %265 = vector.load %arg7[%c0_49, %c0_50] : memref<8x128xf32, #tpu.memory_space<vmem>>, vector<8x128xf32>
    tpu.vector_store %arg7[%c0_49, %c0_50], %262 {strides = array<i32>} : memref<8x128xf32, #tpu.memory_space<vmem>>, vector<8x128xf32>,
    %c0_51 = arith.constant 0 : index
    %c0_52 = arith.constant 0 : index
    %266 = vector.load %arg8[%c0_51, %c0_52] : memref<8x128xf32, #tpu.memory_space<vmem>>, vector<8x128xf32>
    tpu.vector_store %arg8[%c0_51, %c0_52], %263 {strides = array<i32>} : memref<8x128xf32, #tpu.memory_space<vmem>>, vector<8x128xf32>,
    %c0_53 = arith.constant 0 : index
    %c0_54 = arith.constant 0 : index
    %267 = vector.load %arg9[%c0_53, %c0_54] : memref<8x128xf32, #tpu.memory_space<vmem>>, vector<8x128xf32>
    tpu.vector_store %arg9[%c0_53, %c0_54], %264 {strides = array<i32>} : memref<8x128xf32, #tpu.memory_space<vmem>>, vector<8x128xf32>,
    %c0_i32_55 = arith.constant 0 : i32
    %268 = arith.cmpi eq, %arg0, %c0_i32_55 : i32
    %269 = arith.extui %268 : i1 to i32
    %c0_i32_56 = arith.constant 0 : i32
    %270 = arith.cmpi ne, %269, %c0_i32_56 : i32
    scf.if %270 {
      %c0_57 = arith.constant 0 : index
      %c0_58 = arith.constant 0 : index
      %271 = vector.load %arg6[%c0_57, %c0_58] : memref<8x256xf32, #tpu.memory_space<vmem>>, vector<8x128xf32>
      tpu.vector_store %arg6[%c0_57, %c0_58], %263 {strides = array<i32>} : memref<8x256xf32, #tpu.memory_space<vmem>>, vector<8x128xf32>,
      %cst_59 = arith.constant 1.250000e-01 : f32
      %272 = vector.broadcast %cst_59 : f32 to vector<8x128xf32>
      %273 = arith.mulf %264, %272 : vector<8x128xf32>
      %c0_60 = arith.constant 0 : index
      %c128 = arith.constant 128 : index
      %274 = vector.load %arg6[%c0_60, %c128] : memref<8x256xf32, #tpu.memory_space<vmem>>, vector<8x128xf32>
      tpu.vector_store %arg6[%c0_60, %c128], %273 {strides = array<i32>} : memref<8x256xf32, #tpu.memory_space<vmem>>, vector<8x128xf32>,
    } else {
    }
    return
  }
  func.func @transform_0(%arg0: i32) -> (i32, i32, i32) {
    %c0_i32 = arith.constant 0 : i32
    %c0_i32_0 = arith.constant 0 : i32
    %c0_i32_1 = arith.constant 0 : i32
    return %arg0, %c0_i32, %c0_i32_0 : i32, i32, i32
  }
  func.func @transform_1(%arg0: i32) -> (i32, i32) {
    %c0_i32 = arith.constant 0 : i32
    %c0_i32_0 = arith.constant 0 : i32
    %c0_i32_1 = arith.constant 0 : i32
    return %c0_i32, %c0_i32_0 : i32, i32
  }
  func.func @transform_2(%arg0: i32) -> (i32, i32) {
    %c0_i32 = arith.constant 0 : i32
    %c0_i32_0 = arith.constant 0 : i32
    %c0_i32_1 = arith.constant 0 : i32
    return %c0_i32, %c0_i32_0 : i32, i32
  }
  func.func @transform_3(%arg0: i32) -> (i32, i32) {
    %c0_i32 = arith.constant 0 : i32
    %c0_i32_0 = arith.constant 0 : i32
    %c0_i32_1 = arith.constant 0 : i32
    return %c0_i32, %c0_i32_0 : i32, i32
  }
  func.func @transform_4(%arg0: i32) -> (i32, i32) {
    %c0_i32 = arith.constant 0 : i32
    %c0_i32_0 = arith.constant 0 : i32
    %c0_i32_1 = arith.constant 0 : i32
    return %c0_i32, %c0_i32_0 : i32, i32
  }
  func.func @transform_5(%arg0: i32) -> (i32, i32) {
    %c0_i32 = arith.constant 0 : i32
    %c0_i32_0 = arith.constant 0 : i32
    %c0_i32_1 = arith.constant 0 : i32
    return %c0_i32, %c0_i32_0 : i32, i32
  }
}

</mosaic_0001>

<bundles_post_ra>
// kernel: tpu_custom_call.1
= control target key start
LH: loop header
LB: loop body
LE: loop exit
PB: predicated region body
PF: predicated region fallthrough
CT: control target
= control target key end

     0   :  { %10 = vsyncpa [#allocation6], 0  ;;  %s3421_s0 = inlined_call_operand.hbm [shape: f32[1,64,128], index: 0, kind: input, shape index: {}]   ;;  %s3422_s1 = inlined_call_operand.hbm [shape: f32[128,384], index: 1, kind: input, shape index: {}]   ;;  %s3423_s2 = inlined_call_operand.vmem [shape: f32[1,384], index: 2, kind: input, shape index: {}]   ;;  %s3424_s3 = inlined_call_operand.hbm [shape: f32[128,384], index: 3, kind: input, shape index: {}]   ;;  %s3425_s4 = inlined_call_operand.vmem [shape: f32[1,128], index: 4, kind: input, shape index: {}]   ;;  %s3426_s5 = inlined_call_operand.hbm [shape: f32[8,256], index: 5, kind: output, shape index: {}]  }
   0x1   :  { %11 = vsyncpa [#allocation9], 0 }
   0x2   :  { %12 = vsyncpa [#allocation7], 0  ;;  %s2489_s18 = smov [#allocation8]  }
   0x3   :  { %s30_s19 = sshll.u32 %s2489_s18, 4  ;;  %s31_s19 = int_to_ptr.vmem [resolvable:$true] %s30_s19 }
   0x4   :  { %s2411_s20 = scalar_lea.vmem %s31_s19, 6144  ;;  %p2416_p1 = scmp.lt.s32.totalorder %s31_s19, %s31_s19 }
   0x5   :  { %p2412_p0 = scmp.ne.s32.totalorder %s31_s19, %s2411_s20  ;;  %p2417_p2 = scmp.lt.s32.totalorder %s2411_s20, %s2411_s20 }
   0x7   :  { %p2418_p3 = por %p2417_p2, %p2416_p1 }
   0x9   :  { %p2419_p4 = pnand %p2418_p3, %p2412_p0 }
   0xb   :  { %2422 = shalt.err (!%p2419_p4)
}
   0xc   :  { %s2490_s21 = smov 384   ;;  %s2491_s22 = smov 24  }
   0xd   :  { %36 = dma.hbm_to_vmem [thread:$0]  %s3422_s1, 6144, %s31_s19, [#allocation9], %s2490_s21, %s2490_s21, %s2491_s22  }
   0xe   :  { %s2492_s25 = smov [#allocation5]  }
   0xf   :  { %s18_s26 = sshll.u32 %s2492_s25, 4  ;;  %s19_s26 = int_to_ptr.vmem [resolvable:$true] %s18_s26 }
  0x10   :  { %s2431_s27 = scalar_lea.vmem %s19_s26, 1024  ;;  %p2436_p6 = scmp.lt.s32.totalorder %s19_s26, %s19_s26 }
  0x11   :  { %p2432_p5 = scmp.ne.s32.totalorder %s19_s26, %s2431_s27  ;;  %p2437_p7 = scmp.lt.s32.totalorder %s2431_s27, %s2431_s27 }
  0x13   :  { %p2438_p8 = por %p2437_p7, %p2436_p6 }
  0x15   :  { %p2439_p9 = pnand %p2438_p8, %p2432_p5 }
  0x17   :  { %2442 = shalt.err (!%p2439_p9)
}
  0x18   :  { %s2493_s28 = smov 128   ;;  %s2494_s29 = smov 8  }
  0x19   :  { %24 = dma.hbm_to_vmem [thread:$0]  %s3421_s0, 1024, %s19_s26, [#allocation6], %s2493_s28, %s2493_s28, %s2494_s29  }
  0x1a   :  { %s2495_s7 = smov [#allocation10]  }
  0x1b   :  { %s44_s8 = sshll.u32 %s2495_s7, 4  ;;  %s45_s8 = int_to_ptr.vmem [resolvable:$true] %s44_s8 }
  0x1c   :  { %s2451_s1 = scalar_lea.vmem %s45_s8, 6144  ;;  %p2456_p11 = scmp.lt.s32.totalorder %s45_s8, %s45_s8 }
  0x1d   :  { %p2452_p10 = scmp.ne.s32.totalorder %s45_s8, %s2451_s1  ;;  %p2457_p12 = scmp.lt.s32.totalorder %s2451_s1, %s2451_s1 }
  0x1f   :  { %p2458_p13 = por %p2457_p12, %p2456_p11 }
  0x21   :  { %p2459_p0 = pnand %p2458_p13, %p2452_p10 }
  0x23   :  { %2462 = shalt.err (!%p2459_p0)
}
  0x24   :  { %50 = dma.hbm_to_vmem [thread:$0]  %s3424_s3, 6144, %s45_s8, [#allocation9], %s2490_s21, %s2490_s21, %s2491_s22  }
  0x25   :  { %2483 = dma.done.wait [#allocation6], 1024  }
  0x26   :  { %2484 = vsyncadd [#allocation6], 4294966272 }
  0x27   :  { %2485 = dma.done.wait [#allocation9], 12288  }
  0x28   :  { %2486 = vsyncadd [#allocation9], 4294955008  ;;  %v3427_v0 = vmov 0.0   ;;  %v123_v1 = vld [vmem:[#allocation8 + $0x170] sm:$0xff]  ;;  %v122_v2 = vld [vmem:[#allocation8 + $0x168] sm:$0xff]  ;;  %vm2497_vm0 = vmmov 0  }
  0x29   :  { %206 = vmatprep.mubr.f32.mxu0 %v3427_v0  ;;  %v120_v3 = vld [vmem:[#allocation8 + $0x158] sm:$0xff]  ;;  %142 = vmatprep.subr.mxu0 %v123_v1  ;;  %v119_v4 = vld [vmem:[#allocation8 + $0x150] sm:$0xff]  ;;  %v117_v5 = vld [vmem:[#allocation8 + $0x140] sm:$0xff] }
  0x2a   :  { %143 = vmatpush1.msra.mxu0 %v122_v2  ;;  %v116_v6 = vld [vmem:[#allocation8 + $0x138] sm:$0xff]  ;;  %v114_v7 = vld [vmem:[#allocation8 + $0x128] sm:$0xff]  ;;  %v113_v8 = vld [vmem:[#allocation8 + $0x120] sm:$0xff] }
  0x2b   :  { %144 = vmatprep.subr.mxu0 %v120_v3  ;;  %v111_v9 = vld [vmem:[#allocation8 + $0x110] sm:$0xff]  ;;  %v110_v10 = vld [vmem:[#allocation8 + $0x108] sm:$0xff]  ;;  %v108_v11 = vld [vmem:[#allocation8 + $0xf8] sm:$0xff] }
  0x2c   :  { %145 = vmatpush1.msra.mxu0 %v119_v4  ;;  %v107_v12 = vld [vmem:[#allocation8 + $0xf0] sm:$0xff]  ;;  %v105_v13 = vld [vmem:[#allocation8 + $0xe0] sm:$0xff]  ;;  %v124_v14 = vld [vmem:[#allocation8 + $0x178] sm:$0xff] }
  0x2d   :  { %146 = vmatprep.subr.mxu0 %v117_v5  ;;  %v104_v15 = vld [vmem:[#allocation8 + $0xd8] sm:$0xff]  ;;  %1940 = vmatprep.subr.mxu1 %v124_v14  ;;  %v121_v16 = vld [vmem:[#allocation8 + $0x160] sm:$0xff]  ;;  %v102_v17 = vld [vmem:[#allocation8 + $0xc8] sm:$0xff] }
  0x2e   :  { %147 = vmatpush1.msra.mxu0 %v116_v6  ;;  %1941 = vmatpush3.msra.mxu1 %v124_v14  ;;  %v118_v18 = vld [vmem:[#allocation8 + $0x148] sm:$0xff]  ;;  %v101_v19 = vld [vmem:[#allocation8 + $0xc0] sm:$0xff]  ;;  %v99_v20 = vld [vmem:[#allocation8 + $0xb0] sm:$0xff] }
  0x2f   :  { %148 = vmatprep.subr.mxu0 %v114_v7  ;;  %1942 = vmatprep.subr.mxu1 %v121_v16  ;;  %v115_v21 = vld [vmem:[#allocation8 + $0x130] sm:$0xff]  ;;  %v98_v22 = vld [vmem:[#allocation8 + $0xa8] sm:$0xff]  ;;  %v96_v23 = vld [vmem:[#allocation8 + $0x98] sm:$0xff] }
  0x30   :  { %149 = vmatpush1.msra.mxu0 %v113_v8  ;;  %1943 = vmatpush3.msra.mxu1 %v121_v16  ;;  %v112_v24 = vld [vmem:[#allocation8 + $0x118] sm:$0xff]  ;;  %v95_v25 = vld [vmem:[#allocation8 + $0x90] sm:$0xff]  ;;  %v93_v26 = vld [vmem:[#allocation8 + $0x80] sm:$0xff] }
  0x31   :  { %150 = vmatprep.subr.mxu0 %v111_v9  ;;  %1944 = vmatprep.subr.mxu1 %v118_v18  ;;  %v109_v27 = vld [vmem:[#allocation8 + $0x100] sm:$0xff]  ;;  %v92_v28 = vld [vmem:[#allocation8 + $0x78] sm:$0xff]  ;;  %v90_v29 = vld [vmem:[#allocation8 + $0x68] sm:$0xff] }
  0x32   :  { %151 = vmatpush1.msra.mxu0 %v110_v10  ;;  %1945 = vmatpush3.msra.mxu1 %v118_v18  ;;  %v106_v30 = vld [vmem:[#allocation8 + $0xe8] sm:$0xff]  ;;  %v89_v31 = vld [vmem:[#allocation8 + $0x60] sm:$0xff]  ;;  %v87_v32 = vld [vmem:[#allocation8 + $0x50] sm:$0xff] }
  0x33   :  { %152 = vmatprep.subr.mxu0 %v108_v11  ;;  %1946 = vmatprep.subr.mxu1 %v115_v21  ;;  %v103_v33 = vld [vmem:[#allocation8 + $0xd0] sm:$0xff]  ;;  %v86_v34 = vld [vmem:[#allocation8 + $0x48] sm:$0xff]  ;;  %v84_v35 = vld [vmem:[#allocation8 + $0x38] sm:$0xff] }
  0x34   :  { %153 = vmatpush1.msra.mxu0 %v107_v12  ;;  %1947 = vmatpush3.msra.mxu1 %v115_v21  ;;  %v100_v36 = vld [vmem:[#allocation8 + $0xb8] sm:$0xff]  ;;  %v83_v37 = vld [vmem:[#allocation8 + $0x30] sm:$0xff]  ;;  %v81_v38 = vld [vmem:[#allocation8 + $0x20] sm:$0xff] }
  0x35   :  { %154 = vmatprep.subr.mxu0 %v105_v13  ;;  %1948 = vmatprep.subr.mxu1 %v112_v24  ;;  %v97_v39 = vld [vmem:[#allocation8 + $0xa0] sm:$0xff]  ;;  %v80_v40 = vld [vmem:[#allocation8 + $0x18] sm:$0xff]  ;;  %v78_v41 = vld [vmem:[#allocation8 + $0x8] sm:$0xff] }
  0x36   :  { %155 = vmatpush1.msra.mxu0 %v104_v15  ;;  %1949 = vmatpush3.msra.mxu1 %v112_v24  ;;  %v94_v42 = vld [vmem:[#allocation8 + $0x88] sm:$0xff]  ;;  %v77_v43 = vld [vmem:[#allocation8] sm:$0xff]  ;;  %v2541_v45 = vld [vmem:[#allocation10 + $0x170] sm:$0xff] }
  0x37   :  { %156 = vmatprep.subr.mxu0 %v102_v17  ;;  %1950 = vmatprep.subr.mxu1 %v109_v27  ;;  %v2539_v44 = vld [vmem:[#allocation5] sm:$0xff]  ;;  %3453 = vst [vmem:[#allocation15_spill] sm:$0xff] %v2541_v45  ;;  %v2543_v46 = vld [vmem:[#allocation10 + $0x168] sm:$0xff]  ;;  %v2545_v47 = vld [vmem:[#allocation10 + $0x158] sm:$0xff] }
  0x38   :  { %157 = vmatpush1.msra.mxu0 %v101_v19  ;;  %1951 = vmatpush3.msra.mxu1 %v109_v27  ;;  %v91_v48 = vld [vmem:[#allocation8 + $0x70] sm:$0xff]  ;;  %v2553_v50 = vld [vmem:[#allocation5 + $0x8] sm:$0xff]  ;;  %v2555_v51 = vld [vmem:[#allocation10 + $0x140] sm:$0xff] }
  0x39   :  { %158 = vmatprep.subr.mxu0 %v99_v20  ;;  %1952 = vmatprep.subr.mxu1 %v106_v30  ;;  %v2549_v49 = vld [vmem:[#allocation10 + $0x150] sm:$0xff]  ;;  %v2558_v52 = vld [vmem:[#allocation10 + $0x138] sm:$0xff]  ;;  %v2561_v53 = vld [vmem:[#allocation10 + $0x128] sm:$0xff] }
  0x3a   :  { %159 = vmatpush1.msra.mxu0 %v98_v22  ;;  %1953 = vmatpush3.msra.mxu1 %v106_v30  ;;  %v88_v54 = vld [vmem:[#allocation8 + $0x58] sm:$0xff]  ;;  %v2565_v55 = vld [vmem:[#allocation10 + $0x120] sm:$0xff]  ;;  %v2569_v56 = vld [vmem:[#allocation5 + $0x10] sm:$0xff] }
  0x3b   :  { %160 = vmatprep.subr.mxu0 %v96_v23  ;;  %1954 = vmatprep.subr.mxu1 %v103_v33  ;;  %v2571_v57 = vld [vmem:[#allocation10 + $0x110] sm:$0xff]  ;;  %v2574_v58 = vld [vmem:[#allocation10 + $0x108] sm:$0xff]  ;;  %v2577_v59 = vld [vmem:[#allocation10 + $0xf8] sm:$0xff] }
  0x3c   :  { %161 = vmatpush1.msra.mxu0 %v95_v25  ;;  %1955 = vmatpush3.msra.mxu1 %v103_v33  ;;  %v85_v60 = vld [vmem:[#allocation8 + $0x40] sm:$0xff]  ;;  %v2581_v61 = vld [vmem:[#allocation10 + $0xf0] sm:$0xff]  ;;  %v2585_v62 = vld [vmem:[#allocation5 + $0x18] sm:$0xff] }
  0x3d   :  { %162 = vmatprep.subr.mxu0 %v93_v26  ;;  %1956 = vmatprep.subr.mxu1 %v100_v36  ;;  %v2587_v63 = vld [vmem:[#allocation10 + $0xe0] sm:$0xff]  ;;  %v2590_v1 = vld [vmem:[#allocation10 + $0xd8] sm:$0xff]  ;;  %v2593_v2 = vld [vmem:[#allocation10 + $0xc8] sm:$0xff] }
  0x3e   :  { %163 = vmatpush1.msra.mxu0 %v92_v28  ;;  %1957 = vmatpush3.msra.mxu1 %v100_v36  ;;  %v82_v3 = vld [vmem:[#allocation8 + $0x28] sm:$0xff]  ;;  %v2597_v4 = vld [vmem:[#allocation10 + $0xc0] sm:$0xff]  ;;  %v2603_v6 = vld [vmem:[#allocation10 + $0xb0] sm:$0xff] }
  0x3f   :  { %164 = vmatprep.subr.mxu0 %v90_v29  ;;  %1958 = vmatprep.subr.mxu1 %v97_v39  ;;  %v2601_v5 = vld [vmem:[#allocation5 + $0x20] sm:$0xff]  ;;  %v2606_v7 = vld [vmem:[#allocation10 + $0xa8] sm:$0xff]  ;;  %v2609_v8 = vld [vmem:[#allocation10 + $0x98] sm:$0xff] }
  0x40   :  { %165 = vmatpush1.msra.mxu0 %v89_v31  ;;  %1959 = vmatpush3.msra.mxu1 %v97_v39  ;;  %v79_v9 = vld [vmem:[#allocation8 + $0x10] sm:$0xff]  ;;  %v74_v11 = vld [vmem:[#allocation5 + $0x28] sm:$0xff]  ;;  %v2617_v12 = vld [vmem:[#allocation10 + $0x80] sm:$0xff] }
  0x41   :  { %166 = vmatprep.subr.mxu0 %v87_v32  ;;  %1960 = vmatprep.subr.mxu1 %v94_v42  ;;  %v2613_v10 = vld [vmem:[#allocation10 + $0x90] sm:$0xff]  ;;  %v2620_v13 = vld [vmem:[#allocation10 + $0x78] sm:$0xff]  ;;  %v2623_v14 = vld [vmem:[#allocation10 + $0x68] sm:$0xff] }
  0x42   :  { %167 = vmatpush1.msra.mxu0 %v86_v34  ;;  %1961 = vmatpush3.msra.mxu1 %v94_v42  ;;  %v2626_v15 = vld [vmem:[#allocation10 + $0x60] sm:$0xff]  ;;  %v75_v16 = vld [vmem:[#allocation5 + $0x30] sm:$0xff]  ;;  %v2633_v18 = vld [vmem:[#allocation10 + $0x48] sm:$0xff]  ;;  %v127_v42 = vlaneseq }
  0x43   :  { %168 = vmatprep.subr.mxu0 %v84_v35  ;;  %1962 = vmatprep.subr.mxu1 %v91_v48  ;;  %v2630_v17 = vld [vmem:[#allocation10 + $0x50] sm:$0xff]  ;;  %v2637_v19 = vld [vmem:[#allocation10 + $0x38] sm:$0xff]  ;;  %v2647_v23 = vld [vmem:[#allocation10 + $0x20] sm:$0xff] }
  0x44   :  { %169 = vmatpush1.msra.mxu0 %v83_v37  ;;  %1963 = vmatpush3.msra.mxu1 %v91_v48  ;;  %v2641_v20 = vld [vmem:[#allocation10 + $0x30] sm:$0xff]  ;;  %v2643_v21 = vld [vmem:[#allocation10 + $0x178] sm:$0xff]  ;;  %v2654_v25 = vld [vmem:[#allocation10 + $0x8] sm:$0xff] }
  0x45   :  { %170 = vmatprep.subr.mxu0 %v81_v38  ;;  %1964 = vmatprep.subr.mxu1 %v88_v54  ;;  %v76_v22 = vld [vmem:[#allocation5 + $0x38] sm:$0xff]  ;;  %3455 = vst [vmem:[#allocation17_spill] sm:$0xff] %v2654_v25  ;;  %v2658_v26 = vld [vmem:[#allocation10] sm:$0xff]  ;;  %v2666_v28 = vld [vmem:[#allocation10 + $0x148] sm:$0xff] }
  0x46   :  { %171 = vmatpush1.msra.mxu0 %v80_v40  ;;  %1965 = vmatpush3.msra.mxu1 %v88_v54  ;;  %v2650_v24 = vld [vmem:[#allocation10 + $0x18] sm:$0xff]  ;;  %3456 = vst [vmem:[#allocation18_spill] sm:$0xff] %v2658_v26  ;;  %v2660_v27 = vld [vmem:[#allocation10 + $0x160] sm:$0xff]  ;;  %v2672_v29 = vld [vmem:[#allocation10 + $0x130] sm:$0xff] }
  0x47   :  { %172 = vmatprep.subr.mxu0 %v78_v41  ;;  %1966 = vmatprep.subr.mxu1 %v85_v60  ;;  %3454 = vst [vmem:[#allocation16_spill] sm:$0xff] %v2650_v24  ;;  %v2677_v30 = vld [vmem:[#allocation10 + $0x118] sm:$0xff]  ;;  %v2683_v31 = vld [vmem:[#allocation10 + $0x100] sm:$0xff]  ;;  %v2689_v32 = vld [vmem:[#allocation10 + $0xe8] sm:$0xff] }
  0x48   :  { %173 = vmatpush1.msra.mxu0 %v77_v43  ;;  %1967 = vmatpush3.msra.mxu1 %v85_v60  ;;  %v2693_v33 = vld [vmem:[#allocation10 + $0xd0] sm:$0xff]  ;;  %v2699_v34 = vld [vmem:[#allocation10 + $0xb8] sm:$0xff]  ;;  %v2705_v35 = vld [vmem:[#allocation10 + $0xa0] sm:$0xff]  ;;  %v128_v43 = vshrl.u32 %v127_v42, 7 }
  0x49   :  { %207 = vmatmul.mubr.f32.vlgmr.msra.gmra.mxu0 %v2539_v44  ;;  %418 = vmatprep.subr.mxu0 %v2541_v45  ;;  %v2711_v36 = vld [vmem:[#allocation10 + $0x88] sm:$0xff]  ;;  %v2717_v37 = vld [vmem:[#allocation10 + $0x70] sm:$0xff]  ;;  %v2723_v38 = vld [vmem:[#allocation10 + $0x58] sm:$0xff] }
  0x4a   :  { %419 = vmatpush1.msra.mxu0 %v2543_v46  ;;  %212 = vmatprep.mubr.f32.mxu0 %v3427_v0  ;;  %v2729_v39 = vld [vmem:[#allocation10 + $0x40] sm:$0xff]  ;;  %v2735_v40 = vld [vmem:[#allocation10 + $0x28] sm:$0xff]  ;;  %v2741_v41 = vld [vmem:[#allocation10 + $0x10] sm:$0xff]  ;;  %v133_v54 = vsub.s32 1, %v128_v43 }
  0x4b   :  { %420 = vmatprep.subr.mxu0 %v2545_v47  ;;  %1968 = vmatprep.subr.mxu1 %v82_v3  ;;  %3457 = vst [vmem:[#allocation19_spill] sm:$0xff] %v2735_v40  ;;  %3458 = vst [vmem:[#allocation20_spill] sm:$0xff] %v2741_v41  ;;  %v125_v48 = vld [vmem:[%s3423_s2] sm:$0x7] }
  0x4c   :  { %421 = vmatpush1.msra.mxu0 %v2549_v49  ;;  %1969 = vmatpush3.msra.mxu1 %v82_v3  ;;  %v134_v3 = vrot.slane %v125_v48, %v133_v54 }
  0x4d   :  { %213 = vmatmul.mubr.f32.gmra.mxu0 %v2553_v50  ;;  %422 = vmatprep.subr.mxu0 %v2555_v51 }
  0x4e   :  { %423 = vmatpush1.msra.mxu0 %v2558_v52  ;;  %218 = vmatprep.mubr.f32.mxu0 %v3427_v0 }
  0x4f   :  { %424 = vmatprep.subr.mxu0 %v2561_v53  ;;  %1970 = vmatprep.subr.mxu1 %v79_v9 }
  0x50   :  { %425 = vmatpush1.msra.mxu0 %v2565_v55  ;;  %1971 = vmatpush3.msra.mxu1 %v79_v9 }
  0x51   :  { %219 = vmatmul.mubr.f32.gmra.mxu0 %v2569_v56  ;;  %426 = vmatprep.subr.mxu0 %v2571_v57 }
  0x52   :  { %427 = vmatpush1.msra.mxu0 %v2574_v58  ;;  %224 = vmatprep.mubr.f32.mxu0 %v3427_v0 }
  0x53   :  { %428 = vmatprep.subr.mxu0 %v2577_v59  ;;  %1972 = vmatprep.mubr.f32.mxu1 %v2539_v44  ;;  %v129_v44 = vsub.s32 0, %v128_v43 }
  0x54   :  { %429 = vmatpush1.msra.mxu0 %v2581_v61  ;;  %1984 = vmatprep.subr.mxu1 %v3427_v0 }
  0x55   :  { %225 = vmatmul.mubr.f32.gmra.mxu0 %v2585_v62  ;;  %430 = vmatprep.subr.mxu0 %v2587_v63  ;;  %v130_v60 = vrot.slane %v125_v48, %v129_v44 }
  0x56   :  { %431 = vmatpush1.msra.mxu0 %v2590_v1  ;;  %230 = vmatprep.mubr.f32.mxu0 %v3427_v0 }
  0x57   :  { %432 = vmatprep.subr.mxu0 %v2593_v2  ;;  %1973 = vmatmul.mubr.f32.vlgmr.msra.gmra.mxu1 %v2553_v50 }
  0x58   :  { %433 = vmatpush1.msra.mxu0 %v2597_v4  ;;  %1985 = vmatpush3.msra.mxu1 %v2643_v21 }
  0x59   :  { %231 = vmatmul.mubr.f32.gmra.mxu0 %v2601_v5  ;;  %434 = vmatprep.subr.mxu0 %v2603_v6 }
  0x5a   :  { %435 = vmatpush1.msra.mxu0 %v2606_v7  ;;  %236 = vmatprep.mubr.f32.mxu0 %v3427_v0 }
  0x5b   :  { %436 = vmatprep.subr.mxu0 %v2609_v8  ;;  %1986 = vmatprep.subr.mxu1 %v3427_v0 }
  0x5c   :  { %437 = vmatpush1.msra.mxu0 %v2613_v10  ;;  %1987 = vmatpush3.msra.mxu1 %v2660_v27 }
  0x5d   :  { %237 = vmatmul.mubr.f32.gmra.mxu0 %v74_v11  ;;  %438 = vmatprep.subr.mxu0 %v2617_v12 }
  0x5e   :  { %439 = vmatpush1.msra.mxu0 %v2620_v13  ;;  %242 = vmatprep.mubr.f32.mxu0 %v3427_v0 }
  0x5f   :  { %440 = vmatprep.subr.mxu0 %v2623_v14  ;;  %1988 = vmatprep.subr.mxu1 %v3427_v0 }
  0x60   :  { %441 = vmatpush1.msra.mxu0 %v2626_v15  ;;  %1989 = vmatpush3.msra.mxu1 %v2666_v28 }
  0x61   :  { %243 = vmatmul.mubr.f32.gmra.mxu0 %v75_v16  ;;  %442 = vmatprep.subr.mxu0 %v2630_v17 }
  0x62   :  { %443 = vmatpush1.msra.mxu0 %v2633_v18  ;;  %248 = vmatprep.mubr.f32.mxu0 %v3427_v0 }
  0x63   :  { %444 = vmatprep.subr.mxu0 %v2637_v19  ;;  %1975 = vmatprep.mubr.f32.mxu1 %v2569_v56 }
  0x64   :  { %445 = vmatpush1.msra.mxu0 %v2641_v20  ;;  %1990 = vmatprep.subr.mxu1 %v3427_v0 }
  0x65   :  { %249 = vmatmul.mubr.f32.gmra.mxu0 %v76_v22  ;;  %446 = vmatprep.subr.mxu0 %v2647_v23 }
  0x66   :  { %447 = vmatpush1.msra.mxu0 %v2650_v24  ;;  %482 = vmatprep.mubr.f32.mxu0 %v3427_v0 }
  0x67   :  { %448 = vmatprep.subr.mxu0 %v2654_v25  ;;  %1976 = vmatmul.mubr.f32.gmra.mxu1 %v2585_v62 }
  0x68   :  { %449 = vmatpush1.msra.mxu0 %v2658_v26  ;;  %1991 = vmatpush3.msra.mxu1 %v2672_v29 }
  0x69   :  { %483 = vmatmul.mubr.f32.vlgmr.msra.gmra.mxu0 %v3427_v0  ;;  %1978 = vmatprep.mubr.f32.mxu1 %v2601_v5 }
  0x6a   :  { %1992 = vmatprep.subr.mxu1 %v3427_v0  ;;  %583 = vmatprep.subr.mxu0 %v2541_v45 }
  0x6b   :  { %1993 = vmatpush3.msra.mxu1 %v2677_v30  ;;  %584 = vmatpush1.msra.mxu0 %v2543_v46 }
  0x6c   :  { %1994 = vmatprep.subr.mxu1 %v3427_v0  ;;  %1979 = vmatmul.mubr.f32.gmra.mxu1 %v74_v11 }
  0x6d   :  { %1995 = vmatpush3.msra.mxu1 %v2683_v31  ;;  %1981 = vmatprep.mubr.f32.mxu1 %v75_v16 }
  0x6e   :  { %1996 = vmatprep.subr.mxu1 %v3427_v0  ;;  %585 = vmatprep.subr.mxu0 %v2545_v47 }
  0x6f   :  { %1997 = vmatpush3.msra.mxu1 %v2689_v32  ;;  %586 = vmatpush1.msra.mxu0 %v2549_v49 }
  0x70   :  { %1998 = vmatprep.subr.mxu1 %v3427_v0  ;;  %1982 = vmatmul.mubr.f32.gmra.mxu1 %v76_v22 }
  0x71   :  { %1999 = vmatpush3.msra.mxu1 %v2693_v33  ;;  %2016 = vmatprep.mubr.msk.f32.mxu1 %vm2497_vm0, %v3427_v0 }
  0x72   :  { %2000 = vmatprep.subr.mxu1 %v3427_v0  ;;  %587 = vmatprep.subr.mxu0 %v2555_v51 }
  0x73   :  { %2001 = vmatpush3.msra.mxu1 %v2699_v34  ;;  %588 = vmatpush1.msra.mxu0 %v2558_v52 }
  0x74   :  { %2002 = vmatprep.subr.mxu1 %v3427_v0  ;;  %589 = vmatprep.subr.mxu0 %v2561_v53 }
  0x75   :  { %2003 = vmatpush3.msra.mxu1 %v2705_v35  ;;  %590 = vmatpush1.msra.mxu0 %v2565_v55 }
  0x76   :  { %2004 = vmatprep.subr.mxu1 %v3427_v0  ;;  %591 = vmatprep.subr.mxu0 %v2571_v57 }
  0x77   :  { %2005 = vmatpush3.msra.mxu1 %v2711_v36  ;;  %592 = vmatpush1.msra.mxu0 %v2574_v58 }
  0x78   :  { %2006 = vmatprep.subr.mxu1 %v3427_v0  ;;  %593 = vmatprep.subr.mxu0 %v2577_v59 }
  0x79   :  { %2007 = vmatpush3.msra.mxu1 %v2717_v37  ;;  %594 = vmatpush1.msra.mxu0 %v2581_v61 }
  0x7a   :  { %2008 = vmatprep.subr.mxu1 %v3427_v0  ;;  %595 = vmatprep.subr.mxu0 %v2587_v63 }
  0x7b   :  { %2009 = vmatpush3.msra.mxu1 %v2723_v38  ;;  %596 = vmatpush1.msra.mxu0 %v2590_v1 }
  0x7c   :  { %2010 = vmatprep.subr.mxu1 %v3427_v0  ;;  %597 = vmatprep.subr.mxu0 %v2593_v2 }
  0x7d   :  { %2011 = vmatpush3.msra.mxu1 %v2729_v39  ;;  %598 = vmatpush1.msra.mxu0 %v2597_v4 }
  0x7e   :  { %2012 = vmatprep.subr.mxu1 %v3427_v0  ;;  %599 = vmatprep.subr.mxu0 %v2603_v6 }
  0x7f   :  { %2013 = vmatpush3.msra.mxu1 %v2735_v40  ;;  %600 = vmatpush1.msra.mxu0 %v2606_v7 }
  0x80   :  { %2014 = vmatprep.subr.mxu1 %v3427_v0  ;;  %601 = vmatprep.subr.mxu0 %v2609_v8 }
  0x81   :  { %2015 = vmatpush3.msra.mxu1 %v2741_v41  ;;  %602 = vmatpush1.msra.mxu0 %v2613_v10 }
  0x82   :  { %2017 = vmatmul.mubr.f32.vlgmr.msra.gmra.mxu1 %v3427_v0  ;;  %2019 = vmatprep.subr.mxu1 %v3427_v0 }
  0x83   :  { %2020 = vmatpush3.msra.mxu1 %v2643_v21  ;;  %603 = vmatprep.subr.mxu0 %v2617_v12 }
  0x84   :  { %2021 = vmatprep.subr.mxu1 %v3427_v0  ;;  %604 = vmatpush1.msra.mxu0 %v2620_v13 }
  0x85   :  { %2022 = vmatpush3.msra.mxu1 %v2660_v27  ;;  %605 = vmatprep.subr.mxu0 %v2623_v14 }
  0x86   :  { %2023 = vmatprep.subr.mxu1 %v3427_v0  ;;  %606 = vmatpush1.msra.mxu0 %v2626_v15 }
  0x87   :  { %2024 = vmatpush3.msra.mxu1 %v2666_v28  ;;  %607 = vmatprep.subr.mxu0 %v2630_v17 }
  0x88   :  { %2025 = vmatprep.subr.mxu1 %v3427_v0  ;;  %608 = vmatpush1.msra.mxu0 %v2633_v18 }
  0x89   :  { %2026 = vmatpush3.msra.mxu1 %v2672_v29  ;;  %609 = vmatprep.subr.mxu0 %v2637_v19 }
  0x8a   :  { %2027 = vmatprep.subr.mxu1 %v3427_v0  ;;  %610 = vmatpush1.msra.mxu0 %v2641_v20 }
  0x8b   :  { %2028 = vmatpush3.msra.mxu1 %v2677_v30  ;;  %611 = vmatprep.subr.mxu0 %v2647_v23 }
  0x8c   :  { %2029 = vmatprep.subr.mxu1 %v3427_v0  ;;  %612 = vmatpush1.msra.mxu0 %v2650_v24 }
  0x8d   :  { %2030 = vmatpush3.msra.mxu1 %v2683_v31  ;;  %613 = vmatprep.subr.mxu0 %v2654_v25 }
  0x8e   :  { %2031 = vmatprep.subr.mxu1 %v3427_v0  ;;  %614 = vmatpush1.msra.mxu0 %v2658_v26 }
  0x8f   :  { %2032 = vmatpush3.msra.mxu1 %v2689_v32  ;;  %647 = vmatprep.mubr.f32.mxu0 %v3427_v0 }
  0x90   :  { %2033 = vmatprep.subr.mxu1 %v3427_v0  ;;  %2051 = vmatprep.mubr.msk.f32.mxu1 %vm2497_vm0, %v3427_v0 }
  0x91   :  { %2034 = vmatpush3.msra.mxu1 %v2693_v33  ;;  %748 = vmatprep.subr.mxu0 %v2541_v45 }
  0x92   :  { %2035 = vmatprep.subr.mxu1 %v3427_v0 }
  0x93   :  { %2036 = vmatpush3.msra.mxu1 %v2699_v34 }
  0x94   :  { %2037 = vmatprep.subr.mxu1 %v3427_v0 }
  0x95   :  { %2038 = vmatpush3.msra.mxu1 %v2705_v35 }
  0x96   :  { %2039 = vmatprep.subr.mxu1 %v3427_v0 }
  0x97   :  { %2040 = vmatpush3.msra.mxu1 %v2711_v36 }
  0x98   :  { %2041 = vmatprep.subr.mxu1 %v3427_v0 }
  0x99   :  { %2042 = vmatpush3.msra.mxu1 %v2717_v37 }
  0x9a   :  { %2043 = vmatprep.subr.mxu1 %v3427_v0 }
  0x9b   :  { %2044 = vmatpush3.msra.mxu1 %v2723_v38 }
  0x9c   :  { %2045 = vmatprep.subr.mxu1 %v3427_v0 }
  0x9d   :  { %2046 = vmatpush3.msra.mxu1 %v2729_v39 }
  0x9e   :  { %2047 = vmatprep.subr.mxu1 %v3427_v0 }
  0x9f   :  { %2048 = vmatpush3.msra.mxu1 %v2735_v40 }
  0xa0   :  { %2049 = vmatprep.subr.mxu1 %v3427_v0 }
  0xa1   :  { %2050 = vmatpush3.msra.mxu1 %v2741_v41 }
  0xa2   :  { %2054 = vmatprep.subr.mxu1 %v3427_v0 }
 0x109   :  { %v208_v50 = vpop.f32.mrf.mxu0 }
 0x10b   :  { %v210_v56 = vpop.f32.mrf.mxu0 }
 0x10d   :  { %v214_v62 = vpop.f32.mrf.mxu0 }
 0x10e   :  { %v2803_v5 = vadd.f32 %v214_v62, %v130_v60 }
 0x10f   :  { %v216_v9 = vpop.f32.mrf.mxu0 }
 0x110   :  { %3459 = vst [vmem:[#allocation21_spill] sm:$0xff] %v2803_v5  ;;  %v2805_v11 = vadd.f32 %v216_v9, %v134_v3  ;;  %v137_v9 = vsub.s32 2, %v128_v43 }
 0x111   :  { %v220_v16 = vpop.f32.mrf.mxu0 }
 0x112   :  { %3460 = vst [vmem:[#allocation22_spill] sm:$0xff] %v2805_v11  ;;  %v2807_v22 = vadd.f32 %v220_v16, %v130_v60 }
 0x113   :  { %v222_v42 = vpop.f32.mrf.mxu0 }
 0x114   :  { %3461 = vst [vmem:[#allocation23_spill] sm:$0xff] %v2807_v22  ;;  %v2809_v0 = vadd.f32 %v222_v42, %v134_v3  ;;  %v138_v42 = vrot.slane %v125_v48, %v137_v9 }
 0x115   :  { %v226_v45 = vpop.f32.mrf.mxu0 }
 0x116   :  { %3462 = vst [vmem:[#allocation24_spill] sm:$0xff] %v2809_v0  ;;  %v2811_v41 = vadd.f32 %v226_v45, %v130_v60 }
 0x117   :  { %v228_v26 = vpop.f32.mrf.mxu0 }
 0x118   :  { %3463 = vst [vmem:[#allocation25_spill] sm:$0xff] %v2811_v41  ;;  %v2813_v25 = vadd.f32 %v228_v26, %v134_v3  ;;  %v1974_v26 = vpop.f32.mrf.mxu1 }
 0x119   :  { %v232_v44 = vpop.f32.mrf.mxu0 }
 0x11a   :  { %3464 = vst [vmem:[#allocation26_spill] sm:$0xff] %v2813_v25  ;;  %v2815_v40 = vadd.f32 %v232_v44, %v130_v60  ;;  %v2827_v44 = vadd.f32 %v1974_v26, %v138_v42 }
 0x11b   :  { %v234_v54 = vpop.f32.mrf.mxu0 }
 0x11c   :  { %3465 = vst [vmem:[#allocation27_spill] sm:$0xff] %v2815_v40  ;;  %v2817_v62 = vadd.f32 %v234_v54, %v134_v3 }
 0x11d   :  { %v238_v11 = vpop.f32.mrf.mxu0 }
 0x11e   :  { %3466 = vst [vmem:[#allocation28_spill] sm:$0xff] %v2817_v62  ;;  %v2819_v5 = vadd.f32 %v238_v11, %v130_v60  ;;  %v209_v62 = vadd.f32 %v208_v50, %v130_v60 }
 0x11f   :  { %v240_v16 = vpop.f32.mrf.mxu0 }
 0x120   :  { %3467 = vst [vmem:[#allocation29_spill] sm:$0xff] %v2819_v5  ;;  %v2821_v22 = vadd.f32 %v240_v16, %v134_v3  ;;  %v321_v16 = vpop.f32.mrf.mxu1 }
 0x121   :  { %v244_v0 = vpop.f32.mrf.mxu0 }
 0x122   :  { %3468 = vst [vmem:[#allocation30_spill] sm:$0xff] %v2821_v22  ;;  %v2823_v45 = vadd.f32 %v244_v0, %v130_v60 }
 0x123   :  { %v246_v41 = vpop.f32.mrf.mxu0 }
 0x124   :  { %3469 = vst [vmem:[#allocation31_spill] sm:$0xff] %v2823_v45  ;;  %v2825_v25 = vadd.f32 %v246_v41, %v134_v3  ;;  %v211_v41 = vadd.f32 %v210_v56, %v134_v3 }
 0x125   :  { %v250_v40 = vpop.f32.mrf.mxu0 }
 0x126   :  { %3470 = vst [vmem:[#allocation32_spill] sm:$0xff] %v2825_v25  ;;  %v2829_v54 = vadd.f32 %v250_v40, %v130_v60 }
 0x127   :  { %v252_v43 = vpop.f32.mrf.mxu0  ;;  %v1977_v48 = vpop.f32.mrf.mxu1 }
 0x128   :  { %3471 = vst [vmem:[#allocation33_spill] sm:$0xff] %v2829_v54  ;;  %v2831_v11 = vadd.f32 %v252_v43, %v134_v3  ;;  %v2833_v0 = vadd.f32 %v1977_v48, %v138_v42 }
 0x129   :  { %v484_v5 = vpop.f32.mrf.mxu0  ;;  %v331_v24 = vpop.f32.mrf.mxu1 }
 0x12a   :  { %3472 = vst [vmem:[#allocation34_spill] sm:$0xff] %v2831_v11  ;;  %v559_v22 = vadd.f32 %v484_v5, %v209_v62  ;;  %3473 = vst [vmem:[#allocation35_spill] sm:$0xff] %v2833_v0  ;;  %v2835_v26 = vadd.f32 %v331_v24, %v138_v42 }
 0x12b   :  { %v486_v45 = vpop.f32.mrf.mxu0 }
 0x12c   :  { %v1764_v9 = vmul.f32 -1.442695, %v559_v22  ;;  %3474 = vst [vmem:[#allocation36_spill] sm:$0xff] %v2835_v26  ;;  %v1980_v25 = vpop.f32.mrf.mxu1  ;;  %v566_v40 = vadd.f32 %v486_v45, %v211_v41 }
 0x12d   :  { %v2837_v54 = vadd.f32 %v1980_v25, %v138_v42  ;;  %v2848_v25 = vld [vmem:[%s3425_s4] ss:$0 sm:$0xff] }
 0x12e   :  { %2274 = vpow2.f32 %v1764_v9  ;;  %v341_v50 = vpop.f32.mrf.mxu1  ;;  %v1765_v11 = vmul.f32 -1.442695, %v566_v40 }
 0x12f   :  { %3475 = vst [vmem:[#allocation37_spill] sm:$0xff] %v2837_v54  ;;  %v2839_v60 = vadd.f32 %v341_v50, %v138_v42  ;;  %v322_v50 = vadd.f32 %v321_v16, %v138_v42  ;;  %v3481_v16 = vld [vmem:[#allocation16_spill] sm:$0xff] }
 0x130   :  { %v1983_v43 = vpop.f32.mrf.mxu1  ;;  %2276 = vpow2.f32 %v1765_v11 }
 0x131   :  { %3476 = vst [vmem:[#allocation38_spill] sm:$0xff] %v2839_v60  ;;  %v2841_v5 = vadd.f32 %v1983_v43, %v138_v42 }
 0x132   :  { %v351_v22 = vpop.f32.mrf.mxu1 }
 0x133   :  { %3477 = vst [vmem:[#allocation39_spill] sm:$0xff] %v2841_v5  ;;  %v2843_v62 = vadd.f32 %v351_v22, %v138_v42  ;;  %v3480_v42 = vmov 0.0  }
 0x135   :  { %3478 = vst [vmem:[#allocation40_spill] sm:$0xff] %v2843_v62 }
 0x13b   :  { %v2275_v48 = vpop.eup %2274 }
 0x13c   :  { %v563_v56 = vadd.f32 1.0, %v2275_v48 }
 0x13d   :  { %v2277_v24 = vpop.eup %2276 }
 0x13e   :  { %2278 = vrcp.f32 %v563_v56  ;;  %v570_v9 = vadd.f32 1.0, %v2277_v24  ;;  %v3484_v24 = vld [vmem:[#allocation18_spill] sm:$0xff] }
 0x140   :  { %2280 = vrcp.f32 %v570_v9 }
 0x142   :  { %v555_v3 = vpop.f32.mrf.mxu1 }
 0x143   :  { %v573_v41 = vadd.f32 %v2848_v25, %v555_v3  ;;  %v3485_v3 = vld [vmem:[#allocation20_spill] sm:$0xff] }
 0x144   :  { %v2018_v45 = vpop.f32.mrf.mxu1 }
 0x145   :  { %v3486_v45 = vld [vmem:[#allocation15_spill] sm:$0xff] }
 0x14b   :  { %v2279_v40 = vpop.eup %2278 }
 0x14c   :  { %v574_v43 = vmul.f32 %v2279_v40, %v573_v41  ;;  %v3487_v40 = vld [vmem:[#allocation21_spill] sm:$0xff] }
 0x14d   :  { %v2281_v11 = vpop.eup %2280 }
 0x14e   :  { %v575_v22 = vadd.f32 %v574_v43, %v322_v50  ;;  %v577_v48 = vsub.f32 1.0, %v2281_v11  ;;  %v579_v62 = vmul.f32 0.0, %v2281_v11 }
 0x150   :  { %2282 = vtanh.f32 %v575_v22 }
 0x15d   :  { %v2283_v56 = vpop.eup %2282 }
 0x15e   :  { %v578_v5 = vmul.f32 %v2283_v56, %v577_v48  ;;  %v3488_v48 = vld [vmem:[#allocation22_spill] sm:$0xff] }
 0x160   :  { %v2851_v54 = vadd.f32 %v579_v62, %v578_v5  ;;  %v3482_v5 = vld [vmem:[#allocation19_spill] sm:$0xff]  ;;  %v3483_v62 = vld [vmem:[#allocation17_spill] sm:$0xff] }
 0x162   :  { %3479 = vst [vmem:[#allocation41_spill] sm:$0xff] %v2851_v54  ;;  %648 = vmatmul.mubr.f32.vlgmr.msra.gmra.mxu0 %v2851_v54  ;;  %2052 = vmatmul.mubr.f32.vlgmr.msra.gmra.mxu1 %v2851_v54 }
 0x163   :  { %749 = vmatpush1.msra.mxu0 %v2543_v46  ;;  %2055 = vmatpush3.msra.mxu1 %v2643_v21 }
 0x164   :  { %750 = vmatprep.subr.mxu0 %v2545_v47  ;;  %2056 = vmatprep.subr.mxu1 %v3480_v42 }
 0x165   :  { %751 = vmatpush1.msra.mxu0 %v2549_v49  ;;  %2057 = vmatpush3.msra.mxu1 %v2660_v27 }
 0x166   :  { %752 = vmatprep.subr.mxu0 %v2555_v51  ;;  %2058 = vmatprep.subr.mxu1 %v3480_v42 }
 0x167   :  { %753 = vmatpush1.msra.mxu0 %v2558_v52  ;;  %2059 = vmatpush3.msra.mxu1 %v2666_v28 }
 0x168   :  { %754 = vmatprep.subr.mxu0 %v2561_v53  ;;  %2060 = vmatprep.subr.mxu1 %v3480_v42 }
 0x169   :  { %755 = vmatpush1.msra.mxu0 %v2565_v55  ;;  %2061 = vmatpush3.msra.mxu1 %v2672_v29 }
 0x16a   :  { %756 = vmatprep.subr.mxu0 %v2571_v57  ;;  %2062 = vmatprep.subr.mxu1 %v3480_v42 }
 0x16b   :  { %757 = vmatpush1.msra.mxu0 %v2574_v58  ;;  %2063 = vmatpush3.msra.mxu1 %v2677_v30 }
 0x16c   :  { %758 = vmatprep.subr.mxu0 %v2577_v59  ;;  %2064 = vmatprep.subr.mxu1 %v3480_v42 }
 0x16d   :  { %759 = vmatpush1.msra.mxu0 %v2581_v61  ;;  %2065 = vmatpush3.msra.mxu1 %v2683_v31 }
 0x16e   :  { %760 = vmatprep.subr.mxu0 %v2587_v63  ;;  %2066 = vmatprep.subr.mxu1 %v3480_v42 }
 0x16f   :  { %761 = vmatpush1.msra.mxu0 %v2590_v1  ;;  %2067 = vmatpush3.msra.mxu1 %v2689_v32 }
 0x170   :  { %762 = vmatprep.subr.mxu0 %v2593_v2  ;;  %2068 = vmatprep.subr.mxu1 %v3480_v42 }
 0x171   :  { %763 = vmatpush1.msra.mxu0 %v2597_v4  ;;  %2069 = vmatpush3.msra.mxu1 %v2693_v33 }
 0x172   :  { %764 = vmatprep.subr.mxu0 %v2603_v6  ;;  %2070 = vmatprep.subr.mxu1 %v3480_v42 }
 0x173   :  { %765 = vmatpush1.msra.mxu0 %v2606_v7  ;;  %2071 = vmatpush3.msra.mxu1 %v2699_v34 }
 0x174   :  { %766 = vmatprep.subr.mxu0 %v2609_v8  ;;  %2072 = vmatprep.subr.mxu1 %v3480_v42 }
 0x175   :  { %767 = vmatpush1.msra.mxu0 %v2613_v10  ;;  %2073 = vmatpush3.msra.mxu1 %v2705_v35 }
 0x176   :  { %768 = vmatprep.subr.mxu0 %v2617_v12  ;;  %2074 = vmatprep.subr.mxu1 %v3480_v42 }
 0x177   :  { %769 = vmatpush1.msra.mxu0 %v2620_v13  ;;  %2075 = vmatpush3.msra.mxu1 %v2711_v36 }
 0x178   :  { %770 = vmatprep.subr.mxu0 %v2623_v14  ;;  %2076 = vmatprep.subr.mxu1 %v3480_v42 }
 0x179   :  { %771 = vmatpush1.msra.mxu0 %v2626_v15  ;;  %2077 = vmatpush3.msra.mxu1 %v2717_v37 }
 0x17a   :  { %772 = vmatprep.subr.mxu0 %v2630_v17  ;;  %2078 = vmatprep.subr.mxu1 %v3480_v42 }
 0x17b   :  { %773 = vmatpush1.msra.mxu0 %v2633_v18  ;;  %2079 = vmatpush3.msra.mxu1 %v2723_v38 }
 0x17c   :  { %774 = vmatprep.subr.mxu0 %v2637_v19  ;;  %2080 = vmatprep.subr.mxu1 %v3480_v42 }
 0x17d   :  { %775 = vmatpush1.msra.mxu0 %v2641_v20  ;;  %2081 = vmatpush3.msra.mxu1 %v2729_v39 }
 0x17e   :  { %776 = vmatprep.subr.mxu0 %v2647_v23  ;;  %2082 = vmatprep.subr.mxu1 %v3480_v42 }
 0x17f   :  { %777 = vmatpush1.msra.mxu0 %v3481_v16  ;;  %2083 = vmatpush3.msra.mxu1 %v3482_v5 }
 0x180   :  { %778 = vmatprep.subr.mxu0 %v3483_v62  ;;  %2084 = vmatprep.subr.mxu1 %v3480_v42 }
 0x181   :  { %779 = vmatpush1.msra.mxu0 %v3484_v24  ;;  %812 = vmatprep.mubr.f32.mxu0 %v3480_v42 }
 0x182   :  { %2085 = vmatpush3.msra.mxu1 %v3485_v3  ;;  %2086 = vmatprep.mubr.msk.f32.mxu1 %vm2497_vm0, %v3480_v42 }
 0x183   :  { %913 = vmatprep.subr.mxu0 %v3486_v45  ;;  %2089 = vmatprep.subr.mxu1 %v3480_v42 }
 0x222   :  { %v649_v9 = vpop.f32.mrf.mxu0  ;;  %v720_v41 = vpop.f32.mrf.mxu1 }
 0x223   :  { %v724_v50 = vadd.f32 %v649_v9, %v3487_v40  ;;  %v738_v45 = vadd.f32 %v2848_v25, %v720_v41 }
 0x224   :  { %v2053_v43 = vpop.f32.mrf.mxu1  ;;  %v651_v11 = vpop.f32.mrf.mxu0 }
 0x225   :  { %v1766_v22 = vmul.f32 -1.442695, %v724_v50  ;;  %v731_v56 = vadd.f32 %v651_v11, %v3488_v48 }
 0x227   :  { %2284 = vpow2.f32 %v1766_v22  ;;  %v1767_v60 = vmul.f32 -1.442695, %v731_v56 }
 0x229   :  { %2286 = vpow2.f32 %v1767_v60 }
 0x234   :  { %v2285_v0 = vpop.eup %2284 }
 0x235   :  { %v728_v26 = vadd.f32 1.0, %v2285_v0  ;;  %v3491_v0 = vld [vmem:[#allocation17_spill] sm:$0xff] }
 0x236   :  { %v2287_v3 = vpop.eup %2286 }
 0x237   :  { %2288 = vrcp.f32 %v728_v26  ;;  %v735_v24 = vadd.f32 1.0, %v2287_v3  ;;  %v3492_v26 = vld [vmem:[#allocation18_spill] sm:$0xff] }
 0x239   :  { %2290 = vrcp.f32 %v735_v24 }
 0x244   :  { %v2289_v62 = vpop.eup %2288 }
 0x245   :  { %v739_v5 = vmul.f32 %v2289_v62, %v738_v45  ;;  %v3494_v62 = vld [vmem:[#allocation15_spill] sm:$0xff] }
 0x246   :  { %v2291_v40 = vpop.eup %2290  ;;  %v3495_v45 = vld [vmem:[#allocation23_spill] sm:$0xff] }
 0x247   :  { %v740_v9 = vadd.f32 %v739_v5, %v2827_v44  ;;  %v742_v50 = vsub.f32 1.0, %v2291_v40  ;;  %v744_v11 = vmul.f32 %v2291_v40, %v2851_v54  ;;  %v3490_v44 = vld [vmem:[#allocation19_spill] sm:$0xff]  ;;  %v3493_v5 = vld [vmem:[#allocation20_spill] sm:$0xff] }
 0x248   :  { %v3496_v40 = vld [vmem:[#allocation24_spill] sm:$0xff] }
 0x249   :  { %2292 = vtanh.f32 %v740_v9 }
 0x256   :  { %v2293_v43 = vpop.eup %2292 }
 0x257   :  { %v743_v22 = vmul.f32 %v2293_v43, %v742_v50 }
 0x259   :  { %v2927_v60 = vadd.f32 %v744_v11, %v743_v22 }
 0x25b   :  { %3489 = vst [vmem:[#allocation16_spill] sm:$0xff] %v2927_v60  ;;  %813 = vmatmul.mubr.f32.vlgmr.msra.gmra.mxu0 %v2927_v60  ;;  %2087 = vmatmul.mubr.f32.vlgmr.msra.gmra.mxu1 %v2927_v60 }
 0x25c   :  { %914 = vmatpush1.msra.mxu0 %v2543_v46  ;;  %2090 = vmatpush3.msra.mxu1 %v2643_v21 }
 0x25d   :  { %915 = vmatprep.subr.mxu0 %v2545_v47  ;;  %2091 = vmatprep.subr.mxu1 %v3480_v42 }
 0x25e   :  { %916 = vmatpush1.msra.mxu0 %v2549_v49  ;;  %2092 = vmatpush3.msra.mxu1 %v2660_v27 }
 0x25f   :  { %917 = vmatprep.subr.mxu0 %v2555_v51  ;;  %2093 = vmatprep.subr.mxu1 %v3480_v42 }
 0x260   :  { %918 = vmatpush1.msra.mxu0 %v2558_v52  ;;  %2094 = vmatpush3.msra.mxu1 %v2666_v28 }
 0x261   :  { %919 = vmatprep.subr.mxu0 %v2561_v53  ;;  %2095 = vmatprep.subr.mxu1 %v3480_v42 }
 0x262   :  { %920 = vmatpush1.msra.mxu0 %v2565_v55  ;;  %2096 = vmatpush3.msra.mxu1 %v2672_v29 }
 0x263   :  { %921 = vmatprep.subr.mxu0 %v2571_v57  ;;  %2097 = vmatprep.subr.mxu1 %v3480_v42 }
 0x264   :  { %922 = vmatpush1.msra.mxu0 %v2574_v58  ;;  %2098 = vmatpush3.msra.mxu1 %v2677_v30 }
 0x265   :  { %923 = vmatprep.subr.mxu0 %v2577_v59  ;;  %2099 = vmatprep.subr.mxu1 %v3480_v42 }
 0x266   :  { %924 = vmatpush1.msra.mxu0 %v2581_v61  ;;  %2100 = vmatpush3.msra.mxu1 %v2683_v31 }
 0x267   :  { %925 = vmatprep.subr.mxu0 %v2587_v63  ;;  %2101 = vmatprep.subr.mxu1 %v3480_v42 }
 0x268   :  { %926 = vmatpush1.msra.mxu0 %v2590_v1  ;;  %2102 = vmatpush3.msra.mxu1 %v2689_v32 }
 0x269   :  { %927 = vmatprep.subr.mxu0 %v2593_v2  ;;  %2103 = vmatprep.subr.mxu1 %v3480_v42 }
 0x26a   :  { %928 = vmatpush1.msra.mxu0 %v2597_v4  ;;  %2104 = vmatpush3.msra.mxu1 %v2693_v33 }
 0x26b   :  { %929 = vmatprep.subr.mxu0 %v2603_v6  ;;  %2105 = vmatprep.subr.mxu1 %v3480_v42 }
 0x26c   :  { %930 = vmatpush1.msra.mxu0 %v2606_v7  ;;  %2106 = vmatpush3.msra.mxu1 %v2699_v34 }
 0x26d   :  { %931 = vmatprep.subr.mxu0 %v2609_v8  ;;  %2107 = vmatprep.subr.mxu1 %v3480_v42 }
 0x26e   :  { %932 = vmatpush1.msra.mxu0 %v2613_v10  ;;  %2108 = vmatpush3.msra.mxu1 %v2705_v35 }
 0x26f   :  { %933 = vmatprep.subr.mxu0 %v2617_v12  ;;  %2109 = vmatprep.subr.mxu1 %v3480_v42 }
 0x270   :  { %934 = vmatpush1.msra.mxu0 %v2620_v13  ;;  %2110 = vmatpush3.msra.mxu1 %v2711_v36 }
 0x271   :  { %935 = vmatprep.subr.mxu0 %v2623_v14  ;;  %2111 = vmatprep.subr.mxu1 %v3480_v42 }
 0x272   :  { %936 = vmatpush1.msra.mxu0 %v2626_v15  ;;  %2112 = vmatpush3.msra.mxu1 %v2717_v37 }
 0x273   :  { %937 = vmatprep.subr.mxu0 %v2630_v17  ;;  %2113 = vmatprep.subr.mxu1 %v3480_v42 }
 0x274   :  { %938 = vmatpush1.msra.mxu0 %v2633_v18  ;;  %2114 = vmatpush3.msra.mxu1 %v2723_v38 }
 0x275   :  { %939 = vmatprep.subr.mxu0 %v2637_v19  ;;  %2115 = vmatprep.subr.mxu1 %v3480_v42 }
 0x276   :  { %940 = vmatpush1.msra.mxu0 %v2641_v20  ;;  %2116 = vmatpush3.msra.mxu1 %v2729_v39 }
 0x277   :  { %941 = vmatprep.subr.mxu0 %v2647_v23  ;;  %2117 = vmatprep.subr.mxu1 %v3480_v42 }
 0x278   :  { %942 = vmatpush1.msra.mxu0 %v3481_v16  ;;  %2118 = vmatpush3.msra.mxu1 %v3490_v44  ;;  %v3497_v44 = vld [vmem:[#allocation36_spill] sm:$0xff] }
 0x279   :  { %943 = vmatprep.subr.mxu0 %v3491_v0  ;;  %2119 = vmatprep.subr.mxu1 %v3480_v42 }
 0x27a   :  { %944 = vmatpush1.msra.mxu0 %v3492_v26  ;;  %977 = vmatprep.mubr.f32.mxu0 %v3480_v42 }
 0x27b   :  { %2120 = vmatpush3.msra.mxu1 %v3493_v5  ;;  %2121 = vmatprep.mubr.msk.f32.mxu1 %vm2497_vm0, %v3480_v42 }
 0x27c   :  { %1078 = vmatprep.subr.mxu0 %v3494_v62  ;;  %2124 = vmatprep.subr.mxu1 %v3480_v42 }
 0x31b   :  { %v814_v24 = vpop.f32.mrf.mxu0  ;;  %v885_v3 = vpop.f32.mrf.mxu1 }
 0x31c   :  { %v889_v41 = vadd.f32 %v814_v24, %v3495_v45  ;;  %v903_v62 = vadd.f32 %v2848_v25, %v885_v3  ;;  %v3103_v3 = vld [vmem:[#allocation10 + $0x138] sm:$0xff] }
 0x31d   :  { %v2088_v48 = vpop.f32.mrf.mxu1  ;;  %v816_v9 = vpop.f32.mrf.mxu0 }
 0x31e   :  { %v1768_v56 = vmul.f32 -1.442695, %v889_v41  ;;  %v896_v50 = vadd.f32 %v816_v9, %v3496_v40 }
 0x320   :  { %2294 = vpow2.f32 %v1768_v56  ;;  %v1769_v43 = vmul.f32 -1.442695, %v896_v50  ;;  %v3107_v50 = vld [vmem:[#allocation10 + $0x128] sm:$0xff] }
 0x322   :  { %2296 = vpow2.f32 %v1769_v43  ;;  %v3111_v43 = vld [vmem:[#allocation10 + $0x120] sm:$0xff] }
 0x32d   :  { %v2295_v22 = vpop.eup %2294 }
 0x32e   :  { %v893_v11 = vadd.f32 1.0, %v2295_v22  ;;  %v3119_v22 = vld [vmem:[#allocation10 + $0x108] sm:$0xff] }
 0x32f   :  { %v2297_v54 = vpop.eup %2296 }
 0x330   :  { %2298 = vrcp.f32 %v893_v11  ;;  %v900_v5 = vadd.f32 1.0, %v2297_v54  ;;  %v3127_v11 = vld [vmem:[#allocation10 + $0xf0] sm:$0xff] }
 0x332   :  { %2300 = vrcp.f32 %v900_v5  ;;  %v3099_v5 = vld [vmem:[#allocation10 + $0x140] sm:$0xff] }
 0x33d   :  { %v2299_v26 = vpop.eup %2298 }
 0x33e   :  { %v904_v0 = vmul.f32 %v2299_v26, %v903_v62  ;;  %v3095_v26 = vld [vmem:[#allocation10 + $0x150] sm:$0xff]  ;;  %v3135_v62 = vld [vmem:[#allocation10 + $0xd8] sm:$0xff] }
 0x33f   :  { %v2301_v45 = vpop.eup %2300 }
 0x340   :  { %v905_v24 = vadd.f32 %v904_v0, %v3497_v44  ;;  %v907_v41 = vsub.f32 1.0, %v2301_v45  ;;  %v909_v9 = vmul.f32 %v2301_v45, %v2927_v60  ;;  %v3088_v44 = vld [vmem:[#allocation10 + $0x178] sm:$0xff]  ;;  %v3151_v45 = vld [vmem:[#allocation10 + $0xa8] sm:$0xff] }
 0x341   :  { %v3091_v0 = vld [vmem:[#allocation10 + $0x158] sm:$0xff] }
 0x342   :  { %2302 = vtanh.f32 %v905_v24  ;;  %v3143_v24 = vld [vmem:[#allocation10 + $0xc0] sm:$0xff] }
 0x34f   :  { %v2303_v48 = vpop.eup %2302 }
 0x350   :  { %v908_v56 = vmul.f32 %v2303_v48, %v907_v41  ;;  %v3159_v41 = vld [vmem:[#allocation10 + $0x90] sm:$0xff]  ;;  %v3167_v48 = vld [vmem:[#allocation10 + $0x78] sm:$0xff] }
 0x352   :  { %v3003_v40 = vadd.f32 %v909_v9, %v908_v56  ;;  %v3175_v56 = vld [vmem:[#allocation10 + $0x60] sm:$0xff]  ;;  %v3183_v9 = vld [vmem:[#allocation10 + $0x48] sm:$0xff] }
 0x354   :  { %3498 = vst [vmem:[#allocation21_spill] sm:$0xff] %v3003_v40  ;;  %978 = vmatmul.mubr.f32.vlgmr.msra.gmra.mxu0 %v3003_v40  ;;  %2122 = vmatmul.mubr.f32.vlgmr.msra.gmra.mxu1 %v3003_v40 }
 0x355   :  { %1079 = vmatpush1.msra.mxu0 %v2543_v46  ;;  %2125 = vmatpush3.msra.mxu1 %v2643_v21  ;;  %v3499_v46 = vld [vmem:[#allocation19_spill] sm:$0xff] }
 0x356   :  { %1080 = vmatprep.subr.mxu0 %v2545_v47  ;;  %2126 = vmatprep.subr.mxu1 %v3480_v42  ;;  %v3500_v47 = vld [vmem:[#allocation17_spill] sm:$0xff] }
 0x357   :  { %1081 = vmatpush1.msra.mxu0 %v2549_v49  ;;  %2127 = vmatpush3.msra.mxu1 %v2660_v27  ;;  %v3501_v49 = vld [vmem:[#allocation18_spill] sm:$0xff] }
 0x358   :  { %1082 = vmatprep.subr.mxu0 %v2555_v51  ;;  %2128 = vmatprep.subr.mxu1 %v3480_v42  ;;  %v3502_v51 = vld [vmem:[#allocation20_spill] sm:$0xff] }
 0x359   :  { %1083 = vmatpush1.msra.mxu0 %v2558_v52  ;;  %2129 = vmatpush3.msra.mxu1 %v2666_v28  ;;  %v3072_v52 = vld [vmem:[#allocation10 + $0x170] sm:$0xff] }
 0x35a   :  { %1084 = vmatprep.subr.mxu0 %v2561_v53  ;;  %2130 = vmatprep.subr.mxu1 %v3480_v42 }
 0x35b   :  { %1085 = vmatpush1.msra.mxu0 %v2565_v55  ;;  %2131 = vmatpush3.msra.mxu1 %v2672_v29 }
 0x35c   :  { %1086 = vmatprep.subr.mxu0 %v2571_v57  ;;  %2132 = vmatprep.subr.mxu1 %v3480_v42  ;;  %v3503_v57 = vld [vmem:[#allocation25_spill] sm:$0xff] }
 0x35d   :  { %1087 = vmatpush1.msra.mxu0 %v2574_v58  ;;  %2133 = vmatpush3.msra.mxu1 %v2677_v30 }
 0x35e   :  { %1088 = vmatprep.subr.mxu0 %v2577_v59  ;;  %2134 = vmatprep.subr.mxu1 %v3480_v42 }
 0x35f   :  { %1089 = vmatpush1.msra.mxu0 %v2581_v61  ;;  %2135 = vmatpush3.msra.mxu1 %v2683_v31 }
 0x360   :  { %1090 = vmatprep.subr.mxu0 %v2587_v63  ;;  %2136 = vmatprep.subr.mxu1 %v3480_v42 }
 0x361   :  { %1091 = vmatpush1.msra.mxu0 %v2590_v1  ;;  %2137 = vmatpush3.msra.mxu1 %v2689_v32  ;;  %v3504_v1 = vld [vmem:[#allocation26_spill] sm:$0xff] }
 0x362   :  { %1092 = vmatprep.subr.mxu0 %v2593_v2  ;;  %2138 = vmatprep.subr.mxu1 %v3480_v42 }
 0x363   :  { %1093 = vmatpush1.msra.mxu0 %v2597_v4  ;;  %2139 = vmatpush3.msra.mxu1 %v2693_v33 }
 0x364   :  { %1094 = vmatprep.subr.mxu0 %v2603_v6  ;;  %2140 = vmatprep.subr.mxu1 %v3480_v42 }
 0x365   :  { %1095 = vmatpush1.msra.mxu0 %v2606_v7  ;;  %2141 = vmatpush3.msra.mxu1 %v2699_v34 }
 0x366   :  { %1096 = vmatprep.subr.mxu0 %v2609_v8  ;;  %2142 = vmatprep.subr.mxu1 %v3480_v42 }
 0x367   :  { %1097 = vmatpush1.msra.mxu0 %v2613_v10  ;;  %2143 = vmatpush3.msra.mxu1 %v2705_v35 }
 0x368   :  { %1098 = vmatprep.subr.mxu0 %v2617_v12  ;;  %2144 = vmatprep.subr.mxu1 %v3480_v42 }
 0x369   :  { %1099 = vmatpush1.msra.mxu0 %v2620_v13  ;;  %2145 = vmatpush3.msra.mxu1 %v2711_v36 }
 0x36a   :  { %1100 = vmatprep.subr.mxu0 %v2623_v14  ;;  %2146 = vmatprep.subr.mxu1 %v3480_v42 }
 0x36b   :  { %1101 = vmatpush1.msra.mxu0 %v2626_v15  ;;  %2147 = vmatpush3.msra.mxu1 %v2717_v37  ;;  %v3505_v15 = vld [vmem:[#allocation35_spill] sm:$0xff] }
 0x36c   :  { %1102 = vmatprep.subr.mxu0 %v2630_v17  ;;  %2148 = vmatprep.subr.mxu1 %v3480_v42 }
 0x36d   :  { %1103 = vmatpush1.msra.mxu0 %v2633_v18  ;;  %2149 = vmatpush3.msra.mxu1 %v2723_v38 }
 0x36e   :  { %1104 = vmatprep.subr.mxu0 %v2637_v19  ;;  %2150 = vmatprep.subr.mxu1 %v3480_v42 }
 0x36f   :  { %1105 = vmatpush1.msra.mxu0 %v2641_v20  ;;  %2151 = vmatpush3.msra.mxu1 %v2729_v39 }
 0x370   :  { %1106 = vmatprep.subr.mxu0 %v2647_v23  ;;  %2152 = vmatprep.subr.mxu1 %v3480_v42 }
 0x371   :  { %1107 = vmatpush1.msra.mxu0 %v3481_v16  ;;  %2153 = vmatpush3.msra.mxu1 %v3499_v46  ;;  %v3085_v16 = vld [vmem:[#allocation10 + $0x168] sm:$0xff] }
 0x372   :  { %1108 = vmatprep.subr.mxu0 %v3500_v47  ;;  %2154 = vmatprep.subr.mxu1 %v3480_v42  ;;  %v3191_v47 = vld [vmem:[#allocation10 + $0x30] sm:$0xff] }
 0x373   :  { %1109 = vmatpush1.msra.mxu0 %v3501_v49  ;;  %1142 = vmatprep.mubr.f32.mxu0 %v3480_v42  ;;  %v3199_v49 = vld [vmem:[#allocation10 + $0x18] sm:$0xff] }
 0x374   :  { %2155 = vmatpush3.msra.mxu1 %v3502_v51  ;;  %2156 = vmatprep.mubr.msk.f32.mxu1 %vm2497_vm0, %v3480_v42 }
 0x375   :  { %1243 = vmatprep.subr.mxu0 %v3072_v52  ;;  %2159 = vmatprep.subr.mxu1 %v3480_v42 }
 0x414   :  { %v979_v53 = vpop.f32.mrf.mxu0  ;;  %v1050_v55 = vpop.f32.mrf.mxu1 }
 0x415   :  { %v1054_v58 = vadd.f32 %v979_v53, %v3503_v57  ;;  %v1068_v12 = vadd.f32 %v2848_v25, %v1050_v55  ;;  %v3207_v53 = vld [vmem:[#allocation10] sm:$0xff]  ;;  %v3509_v55 = vld [vmem:[#allocation27_spill] sm:$0xff] }
 0x416   :  { %v2123_v59 = vpop.f32.mrf.mxu1  ;;  %v981_v63 = vpop.f32.mrf.mxu0  ;;  %3508 = vst [vmem:[#allocation23_spill] sm:$0xff] %v3207_v53 }
 0x417   :  { %v1770_v61 = vmul.f32 -1.442695, %v1054_v58  ;;  %v1061_v2 = vadd.f32 %v981_v63, %v3504_v1  ;;  %v3510_v63 = vld [vmem:[#allocation28_spill] sm:$0xff] }
 0x419   :  { %2304 = vpow2.f32 %v1770_v61  ;;  %v1771_v4 = vmul.f32 -1.442695, %v1061_v2 }
 0x41b   :  { %2306 = vpow2.f32 %v1771_v4 }
 0x426   :  { %v2305_v6 = vpop.eup %2304 }
 0x427   :  { %v1058_v7 = vadd.f32 1.0, %v2305_v6 }
 0x428   :  { %v2307_v8 = vpop.eup %2306 }
 0x429   :  { %2308 = vrcp.f32 %v1058_v7  ;;  %v1065_v10 = vadd.f32 1.0, %v2307_v8 }
 0x42b   :  { %2310 = vrcp.f32 %v1065_v10 }
 0x436   :  { %v2309_v13 = vpop.eup %2308 }
 0x437   :  { %v1069_v14 = vmul.f32 %v2309_v13, %v1068_v12  ;;  %v3511_v13 = vld [vmem:[#allocation38_spill] sm:$0xff] }
 0x438   :  { %v2311_v18 = vpop.eup %2310 }
 0x439   :  { %v1070_v17 = vadd.f32 %v1069_v14, %v3505_v15  ;;  %v1072_v19 = vsub.f32 1.0, %v2311_v18  ;;  %v1074_v23 = vmul.f32 %v2311_v18, %v3003_v40 }
 0x43b   :  { %2312 = vtanh.f32 %v1070_v17 }
 0x448   :  { %v2313_v20 = vpop.eup %2312 }
 0x449   :  { %v1073_v21 = vmul.f32 %v2313_v20, %v1072_v19 }
 0x44b   :  { %v3081_v54 = vadd.f32 %v1074_v23, %v1073_v21  ;;  %v3230_v23 = vld [vmem:[#allocation10 + $0x160] sm:$0xff] }
 0x44d   :  { %3506 = vst [vmem:[#allocation22_spill] sm:$0xff] %v3081_v54  ;;  %1143 = vmatmul.mubr.f32.vlgmr.msra.gmra.mxu0 %v3081_v54  ;;  %2157 = vmatmul.mubr.f32.vlgmr.msra.gmra.mxu1 %v3081_v54 }
 0x44e   :  { %1244 = vmatpush1.msra.mxu0 %v3085_v16  ;;  %2160 = vmatpush3.msra.mxu1 %v3088_v44 }
 0x44f   :  { %1245 = vmatprep.subr.mxu0 %v3091_v0  ;;  %2161 = vmatprep.subr.mxu1 %v3480_v42 }
 0x450   :  { %1246 = vmatpush1.msra.mxu0 %v3095_v26  ;;  %2162 = vmatpush3.msra.mxu1 %v2660_v27  ;;  %v3115_v27 = vld [vmem:[#allocation10 + $0x110] sm:$0xff] }
 0x451   :  { %1247 = vmatprep.subr.mxu0 %v3099_v5  ;;  %2163 = vmatprep.subr.mxu1 %v3480_v42 }
 0x452   :  { %1248 = vmatpush1.msra.mxu0 %v3103_v3  ;;  %2164 = vmatpush3.msra.mxu1 %v2666_v28  ;;  %v3123_v28 = vld [vmem:[#allocation10 + $0xf8] sm:$0xff] }
 0x453   :  { %1249 = vmatprep.subr.mxu0 %v3107_v50  ;;  %2165 = vmatprep.subr.mxu1 %v3480_v42 }
 0x454   :  { %1250 = vmatpush1.msra.mxu0 %v3111_v43  ;;  %2166 = vmatpush3.msra.mxu1 %v2672_v29  ;;  %v3131_v29 = vld [vmem:[#allocation10 + $0xe0] sm:$0xff] }
 0x455   :  { %1251 = vmatprep.subr.mxu0 %v3115_v27  ;;  %2167 = vmatprep.subr.mxu1 %v3480_v42 }
 0x456   :  { %1252 = vmatpush1.msra.mxu0 %v3119_v22  ;;  %2168 = vmatpush3.msra.mxu1 %v2677_v30  ;;  %v3139_v30 = vld [vmem:[#allocation10 + $0xc8] sm:$0xff] }
 0x457   :  { %1253 = vmatprep.subr.mxu0 %v3123_v28  ;;  %2169 = vmatprep.subr.mxu1 %v3480_v42 }
 0x458   :  { %1254 = vmatpush1.msra.mxu0 %v3127_v11  ;;  %2170 = vmatpush3.msra.mxu1 %v2683_v31  ;;  %v3147_v31 = vld [vmem:[#allocation10 + $0xb0] sm:$0xff] }
 0x459   :  { %1255 = vmatprep.subr.mxu0 %v3131_v29  ;;  %2171 = vmatprep.subr.mxu1 %v3480_v42 }
 0x45a   :  { %1256 = vmatpush1.msra.mxu0 %v3135_v62  ;;  %2172 = vmatpush3.msra.mxu1 %v2689_v32  ;;  %v3155_v32 = vld [vmem:[#allocation10 + $0x98] sm:$0xff] }
 0x45b   :  { %1257 = vmatprep.subr.mxu0 %v3139_v30  ;;  %2173 = vmatprep.subr.mxu1 %v3480_v42 }
 0x45c   :  { %1258 = vmatpush1.msra.mxu0 %v3143_v24  ;;  %2174 = vmatpush3.msra.mxu1 %v2693_v33  ;;  %v3163_v33 = vld [vmem:[#allocation10 + $0x80] sm:$0xff] }
 0x45d   :  { %1259 = vmatprep.subr.mxu0 %v3147_v31  ;;  %2175 = vmatprep.subr.mxu1 %v3480_v42 }
 0x45e   :  { %1260 = vmatpush1.msra.mxu0 %v3151_v45  ;;  %2176 = vmatpush3.msra.mxu1 %v2699_v34  ;;  %v3171_v34 = vld [vmem:[#allocation10 + $0x68] sm:$0xff] }
 0x45f   :  { %1261 = vmatprep.subr.mxu0 %v3155_v32  ;;  %2177 = vmatprep.subr.mxu1 %v3480_v42 }
 0x460   :  { %1262 = vmatpush1.msra.mxu0 %v3159_v41  ;;  %2178 = vmatpush3.msra.mxu1 %v2705_v35  ;;  %v3179_v35 = vld [vmem:[#allocation10 + $0x50] sm:$0xff] }
 0x461   :  { %1263 = vmatprep.subr.mxu0 %v3163_v33  ;;  %2179 = vmatprep.subr.mxu1 %v3480_v42 }
 0x462   :  { %1264 = vmatpush1.msra.mxu0 %v3167_v48  ;;  %2180 = vmatpush3.msra.mxu1 %v2711_v36  ;;  %v3187_v36 = vld [vmem:[#allocation10 + $0x38] sm:$0xff] }
 0x463   :  { %1265 = vmatprep.subr.mxu0 %v3171_v34  ;;  %2181 = vmatprep.subr.mxu1 %v3480_v42 }
 0x464   :  { %1266 = vmatpush1.msra.mxu0 %v3175_v56  ;;  %2182 = vmatpush3.msra.mxu1 %v2717_v37  ;;  %v3195_v37 = vld [vmem:[#allocation10 + $0x20] sm:$0xff] }
 0x465   :  { %1267 = vmatprep.subr.mxu0 %v3179_v35  ;;  %2183 = vmatprep.subr.mxu1 %v3480_v42 }
 0x466   :  { %1268 = vmatpush1.msra.mxu0 %v3183_v9  ;;  %2184 = vmatpush3.msra.mxu1 %v2723_v38  ;;  %v3203_v38 = vld [vmem:[#allocation10 + $0x8] sm:$0xff] }
 0x467   :  { %1269 = vmatprep.subr.mxu0 %v3187_v36  ;;  %2185 = vmatprep.subr.mxu1 %v3480_v42  ;;  %3507 = vst [vmem:[#allocation15_spill] sm:$0xff] %v3203_v38 }
 0x468   :  { %1270 = vmatpush1.msra.mxu0 %v3191_v47  ;;  %2186 = vmatpush3.msra.mxu1 %v2729_v39 }
 0x469   :  { %1271 = vmatprep.subr.mxu0 %v3195_v37  ;;  %2187 = vmatprep.subr.mxu1 %v3480_v42 }
 0x46a   :  { %1272 = vmatpush1.msra.mxu0 %v3199_v49  ;;  %2188 = vmatpush3.msra.mxu1 %v3499_v46 }
 0x46b   :  { %1273 = vmatprep.subr.mxu0 %v3203_v38  ;;  %2189 = vmatprep.subr.mxu1 %v3480_v42 }
 0x46c   :  { %1274 = vmatpush1.msra.mxu0 %v3207_v53  ;;  %1307 = vmatprep.mubr.f32.mxu0 %v3480_v42 }
 0x46d   :  { %2190 = vmatpush3.msra.mxu1 %v3502_v51  ;;  %2191 = vmatprep.mubr.msk.f32.mxu1 %vm2497_vm0, %v3480_v42 }
 0x46e   :  { %1408 = vmatprep.subr.mxu0 %v3072_v52  ;;  %2194 = vmatprep.subr.mxu1 %v3480_v42 }
 0x50d   :  { %v1144_v39 = vpop.f32.mrf.mxu0  ;;  %v1215_v46 = vpop.f32.mrf.mxu1 }
 0x50e   :  { %v1219_v57 = vadd.f32 %v1144_v39, %v3509_v55  ;;  %v1233_v8 = vadd.f32 %v2848_v25, %v1215_v46  ;;  %v3236_v39 = vld [vmem:[#allocation10 + $0x148] sm:$0xff]  ;;  %v3242_v46 = vld [vmem:[#allocation10 + $0x130] sm:$0xff]  ;;  %v3248_v55 = vld [vmem:[#allocation10 + $0x118] sm:$0xff] }
 0x50f   :  { %v2158_v58 = vpop.f32.mrf.mxu1  ;;  %v1146_v61 = vpop.f32.mrf.mxu0 }
 0x510   :  { %v1772_v59 = vmul.f32 -1.442695, %v1219_v57  ;;  %v1226_v1 = vadd.f32 %v1146_v61, %v3510_v63  ;;  %v3254_v57 = vld [vmem:[#allocation10 + $0x100] sm:$0xff]  ;;  %v3260_v58 = vld [vmem:[#allocation10 + $0xe8] sm:$0xff]  ;;  %v3272_v61 = vld [vmem:[#allocation10 + $0xb8] sm:$0xff] }
 0x511   :  { %v3278_v63 = vld [vmem:[#allocation10 + $0xa0] sm:$0xff] }
 0x512   :  { %2314 = vpow2.f32 %v1772_v59  ;;  %v1773_v2 = vmul.f32 -1.442695, %v1226_v1  ;;  %v3266_v59 = vld [vmem:[#allocation10 + $0xd0] sm:$0xff]  ;;  %v3284_v1 = vld [vmem:[#allocation10 + $0x88] sm:$0xff] }
 0x514   :  { %2316 = vpow2.f32 %v1773_v2  ;;  %v3290_v2 = vld [vmem:[#allocation10 + $0x70] sm:$0xff] }
 0x51f   :  { %v2315_v51 = vpop.eup %2314 }
 0x520   :  { %v1223_v4 = vadd.f32 1.0, %v2315_v51  ;;  %v3296_v51 = vld [vmem:[#allocation10 + $0x58] sm:$0xff] }
 0x521   :  { %v2317_v6 = vpop.eup %2316 }
 0x522   :  { %2318 = vrcp.f32 %v1223_v4  ;;  %v1230_v7 = vadd.f32 1.0, %v2317_v6  ;;  %v3302_v4 = vld [vmem:[#allocation10 + $0x40] sm:$0xff]  ;;  %v3308_v6 = vld [vmem:[#allocation10 + $0x28] sm:$0xff] }
 0x523   :  { %3512 = vst [vmem:[#allocation24_spill] sm:$0xff] %v3308_v6 }
 0x524   :  { %2320 = vrcp.f32 %v1230_v7  ;;  %v3315_v7 = vld [vmem:[#allocation10 + $0x10] sm:$0xff] }
 0x525   :  { %3513 = vst [vmem:[#allocation36_spill] sm:$0xff] %v3315_v7 }
 0x52f   :  { %v2319_v10 = vpop.eup %2318 }
 0x530   :  { %v1234_v12 = vmul.f32 %v2319_v10, %v1233_v8 }
 0x531   :  { %v2321_v15 = vpop.eup %2320 }
 0x532   :  { %v1235_v14 = vadd.f32 %v1234_v12, %v3511_v13  ;;  %v1237_v17 = vsub.f32 1.0, %v2321_v15  ;;  %v1239_v20 = vmul.f32 %v2321_v15, %v3081_v54  ;;  %v3514_v12 = vld [vmem:[#allocation29_spill] sm:$0xff] }
 0x534   :  { %2322 = vtanh.f32 %v1235_v14 }
 0x541   :  { %v2323_v18 = vpop.eup %2322 }
 0x542   :  { %v1238_v19 = vmul.f32 %v2323_v18, %v1237_v17  ;;  %v3515_v18 = vld [vmem:[#allocation30_spill] sm:$0xff] }
 0x544   :  { %v3221_v21 = vadd.f32 %v1239_v20, %v1238_v19 }
 0x546   :  { %1308 = vmatmul.mubr.f32.vlgmr.msra.gmra.mxu0 %v3221_v21  ;;  %2192 = vmatmul.mubr.f32.vlgmr.msra.gmra.mxu1 %v3221_v21 }
 0x547   :  { %1409 = vmatpush1.msra.mxu0 %v3085_v16  ;;  %2195 = vmatpush3.msra.mxu1 %v3088_v44 }
 0x548   :  { %1410 = vmatprep.subr.mxu0 %v3091_v0  ;;  %2196 = vmatprep.subr.mxu1 %v3480_v42 }
 0x549   :  { %1411 = vmatpush1.msra.mxu0 %v3095_v26  ;;  %2197 = vmatpush3.msra.mxu1 %v3230_v23 }
 0x54a   :  { %1412 = vmatprep.subr.mxu0 %v3099_v5  ;;  %2198 = vmatprep.subr.mxu1 %v3480_v42 }
 0x54b   :  { %1413 = vmatpush1.msra.mxu0 %v3103_v3  ;;  %2199 = vmatpush3.msra.mxu1 %v3236_v39 }
 0x54c   :  { %1414 = vmatprep.subr.mxu0 %v3107_v50  ;;  %2200 = vmatprep.subr.mxu1 %v3480_v42 }
 0x54d   :  { %1415 = vmatpush1.msra.mxu0 %v3111_v43  ;;  %2201 = vmatpush3.msra.mxu1 %v3242_v46 }
 0x54e   :  { %1416 = vmatprep.subr.mxu0 %v3115_v27  ;;  %2202 = vmatprep.subr.mxu1 %v3480_v42 }
 0x54f   :  { %1417 = vmatpush1.msra.mxu0 %v3119_v22  ;;  %2203 = vmatpush3.msra.mxu1 %v3248_v55 }
 0x550   :  { %1418 = vmatprep.subr.mxu0 %v3123_v28  ;;  %2204 = vmatprep.subr.mxu1 %v3480_v42 }
 0x551   :  { %1419 = vmatpush1.msra.mxu0 %v3127_v11  ;;  %2205 = vmatpush3.msra.mxu1 %v3254_v57 }
 0x552   :  { %1420 = vmatprep.subr.mxu0 %v3131_v29  ;;  %2206 = vmatprep.subr.mxu1 %v3480_v42 }
 0x553   :  { %1421 = vmatpush1.msra.mxu0 %v3135_v62  ;;  %2207 = vmatpush3.msra.mxu1 %v3260_v58 }
 0x554   :  { %1422 = vmatprep.subr.mxu0 %v3139_v30  ;;  %2208 = vmatprep.subr.mxu1 %v3480_v42 }
 0x555   :  { %1423 = vmatpush1.msra.mxu0 %v3143_v24  ;;  %2209 = vmatpush3.msra.mxu1 %v3266_v59 }
 0x556   :  { %1424 = vmatprep.subr.mxu0 %v3147_v31  ;;  %2210 = vmatprep.subr.mxu1 %v3480_v42 }
 0x557   :  { %1425 = vmatpush1.msra.mxu0 %v3151_v45  ;;  %2211 = vmatpush3.msra.mxu1 %v3272_v61 }
 0x558   :  { %1426 = vmatprep.subr.mxu0 %v3155_v32  ;;  %2212 = vmatprep.subr.mxu1 %v3480_v42 }
 0x559   :  { %1427 = vmatpush1.msra.mxu0 %v3159_v41  ;;  %2213 = vmatpush3.msra.mxu1 %v3278_v63 }
 0x55a   :  { %1428 = vmatprep.subr.mxu0 %v3163_v33  ;;  %2214 = vmatprep.subr.mxu1 %v3480_v42 }
 0x55b   :  { %1429 = vmatpush1.msra.mxu0 %v3167_v48  ;;  %2215 = vmatpush3.msra.mxu1 %v3284_v1 }
 0x55c   :  { %1430 = vmatprep.subr.mxu0 %v3171_v34  ;;  %2216 = vmatprep.subr.mxu1 %v3480_v42 }
 0x55d   :  { %1431 = vmatpush1.msra.mxu0 %v3175_v56  ;;  %2217 = vmatpush3.msra.mxu1 %v3290_v2 }
 0x55e   :  { %1432 = vmatprep.subr.mxu0 %v3179_v35  ;;  %2218 = vmatprep.subr.mxu1 %v3480_v42 }
 0x55f   :  { %1433 = vmatpush1.msra.mxu0 %v3183_v9  ;;  %2219 = vmatpush3.msra.mxu1 %v3296_v51 }
 0x560   :  { %1434 = vmatprep.subr.mxu0 %v3187_v36  ;;  %2220 = vmatprep.subr.mxu1 %v3480_v42 }
 0x561   :  { %1435 = vmatpush1.msra.mxu0 %v3191_v47  ;;  %2221 = vmatpush3.msra.mxu1 %v3302_v4 }
 0x562   :  { %1436 = vmatprep.subr.mxu0 %v3195_v37  ;;  %2222 = vmatprep.subr.mxu1 %v3480_v42 }
 0x563   :  { %1437 = vmatpush1.msra.mxu0 %v3199_v49  ;;  %2223 = vmatpush3.msra.mxu1 %v3308_v6  ;;  %v3516_v6 = vld [vmem:[#allocation37_spill] sm:$0xff] }
 0x564   :  { %1438 = vmatprep.subr.mxu0 %v3203_v38  ;;  %2224 = vmatprep.subr.mxu1 %v3480_v42 }
 0x565   :  { %1439 = vmatpush1.msra.mxu0 %v3207_v53  ;;  %1472 = vmatprep.mubr.f32.mxu0 %v3480_v42 }
 0x566   :  { %2225 = vmatpush3.msra.mxu1 %v3315_v7  ;;  %2226 = vmatprep.mubr.msk.f32.mxu1 %vm2497_vm0, %v3480_v42 }
 0x567   :  { %1573 = vmatprep.subr.mxu0 %v3072_v52  ;;  %2229 = vmatprep.subr.mxu1 %v3480_v42 }
 0x606   :  { %v1309_v8 = vpop.f32.mrf.mxu0  ;;  %v1380_v10 = vpop.f32.mrf.mxu1 }
 0x607   :  { %v1384_v13 = vadd.f32 %v1309_v8, %v3514_v12  ;;  %v1398_v52 = vadd.f32 %v2848_v25, %v1380_v10  ;;  %v3517_v25 = vld [vmem:[#allocation24_spill] sm:$0xff] }
 0x608   :  { %v2193_v14 = vpop.f32.mrf.mxu1  ;;  %v1311_v17 = vpop.f32.mrf.mxu0 }
 0x609   :  { %v1774_v15 = vmul.f32 -1.442695, %v1384_v13  ;;  %v1391_v19 = vadd.f32 %v1311_v17, %v3515_v18 }
 0x60b   :  { %2324 = vpow2.f32 %v1774_v15  ;;  %v1775_v20 = vmul.f32 -1.442695, %v1391_v19 }
 0x60d   :  { %2326 = vpow2.f32 %v1775_v20  ;;  %v3529_v20 = vld [vmem:[#allocation21_spill] sm:$0xff] }
 0x618   :  { %v2325_v54 = vpop.eup %2324 }
 0x619   :  { %v1388_v40 = vadd.f32 1.0, %v2325_v54  ;;  %v3520_v54 = vld [vmem:[#allocation36_spill] sm:$0xff] }
 0x61a   :  { %v2327_v60 = vpop.eup %2326 }
 0x61b   :  { %2328 = vrcp.f32 %v1388_v40  ;;  %v1395_v7 = vadd.f32 1.0, %v2327_v60  ;;  %v3518_v60 = vld [vmem:[#allocation15_spill] sm:$0xff] }
 0x61c   :  { %v3519_v40 = vld [vmem:[#allocation23_spill] sm:$0xff] }
 0x61d   :  { %2330 = vrcp.f32 %v1395_v7  ;;  %v3528_v7 = vld [vmem:[#allocation16_spill] sm:$0xff] }
 0x628   :  { %v2329_v53 = vpop.eup %2328 }
 0x629   :  { %v1399_v38 = vmul.f32 %v2329_v53, %v1398_v52 }
 0x62a   :  { %v2331_v12 = vpop.eup %2330 }
 0x62b   :  { %v1400_v8 = vadd.f32 %v1399_v38, %v3516_v6  ;;  %v1402_v13 = vsub.f32 1.0, %v2331_v12  ;;  %v1404_v17 = vmul.f32 %v2331_v12, %v3221_v21 }
 0x62d   :  { %2332 = vtanh.f32 %v1400_v8 }
 0x63a   :  { %v2333_v14 = vpop.eup %2332 }
 0x63b   :  { %v1403_v15 = vmul.f32 %v2333_v14, %v1402_v13  ;;  %v3530_v13 = vld [vmem:[#allocation22_spill] sm:$0xff] }
 0x63d   :  { %v3327_v18 = vadd.f32 %v1404_v17, %v1403_v15 }
 0x63f   :  { %1473 = vmatmul.mubr.f32.vlgmr.msra.gmra.mxu0 %v3327_v18  ;;  %2227 = vmatmul.mubr.f32.vlgmr.msra.gmra.mxu1 %v3327_v18 }
 0x640   :  { %1574 = vmatpush1.msra.mxu0 %v3085_v16  ;;  %2230 = vmatpush3.msra.mxu1 %v3088_v44 }
 0x641   :  { %1575 = vmatprep.subr.mxu0 %v3091_v0  ;;  %2231 = vmatprep.subr.mxu1 %v3480_v42  ;;  %v3521_v0 = vld [vmem:[#allocation31_spill] sm:$0xff] }
 0x642   :  { %1576 = vmatpush1.msra.mxu0 %v3095_v26  ;;  %2232 = vmatpush3.msra.mxu1 %v3230_v23  ;;  %v3525_v23 = vld [vmem:[#allocation34_spill] sm:$0xff] }
 0x643   :  { %1577 = vmatprep.subr.mxu0 %v3099_v5  ;;  %2233 = vmatprep.subr.mxu1 %v3480_v42 }
 0x644   :  { %1578 = vmatpush1.msra.mxu0 %v3103_v3  ;;  %2234 = vmatpush3.msra.mxu1 %v3236_v39 }
 0x645   :  { %1579 = vmatprep.subr.mxu0 %v3107_v50  ;;  %2235 = vmatprep.subr.mxu1 %v3480_v42 }
 0x646   :  { %1580 = vmatpush1.msra.mxu0 %v3111_v43  ;;  %2236 = vmatpush3.msra.mxu1 %v3242_v46  ;;  %v3522_v43 = vld [vmem:[#allocation32_spill] sm:$0xff] }
 0x647   :  { %1581 = vmatprep.subr.mxu0 %v3115_v27  ;;  %2237 = vmatprep.subr.mxu1 %v3480_v42 }
 0x648   :  { %1582 = vmatpush1.msra.mxu0 %v3119_v22  ;;  %2238 = vmatpush3.msra.mxu1 %v3248_v55 }
 0x649   :  { %1583 = vmatprep.subr.mxu0 %v3123_v28  ;;  %2239 = vmatprep.subr.mxu1 %v3480_v42 }
 0x64a   :  { %1584 = vmatpush1.msra.mxu0 %v3127_v11  ;;  %2240 = vmatpush3.msra.mxu1 %v3254_v57 }
 0x64b   :  { %1585 = vmatprep.subr.mxu0 %v3131_v29  ;;  %2241 = vmatprep.subr.mxu1 %v3480_v42 }
 0x64c   :  { %1586 = vmatpush1.msra.mxu0 %v3135_v62  ;;  %2242 = vmatpush3.msra.mxu1 %v3260_v58 }
 0x64d   :  { %1587 = vmatprep.subr.mxu0 %v3139_v30  ;;  %2243 = vmatprep.subr.mxu1 %v3480_v42 }
 0x64e   :  { %1588 = vmatpush1.msra.mxu0 %v3143_v24  ;;  %2244 = vmatpush3.msra.mxu1 %v3266_v59 }
 0x64f   :  { %1589 = vmatprep.subr.mxu0 %v3147_v31  ;;  %2245 = vmatprep.subr.mxu1 %v3480_v42 }
 0x650   :  { %1590 = vmatpush1.msra.mxu0 %v3151_v45  ;;  %2246 = vmatpush3.msra.mxu1 %v3272_v61  ;;  %v3523_v45 = vld [vmem:[#allocation40_spill] sm:$0xff] }
 0x651   :  { %1591 = vmatprep.subr.mxu0 %v3155_v32  ;;  %2247 = vmatprep.subr.mxu1 %v3480_v42 }
 0x652   :  { %1592 = vmatpush1.msra.mxu0 %v3159_v41  ;;  %2248 = vmatpush3.msra.mxu1 %v3278_v63 }
 0x653   :  { %1593 = vmatprep.subr.mxu0 %v3163_v33  ;;  %2249 = vmatprep.subr.mxu1 %v3480_v42 }
 0x654   :  { %1594 = vmatpush1.msra.mxu0 %v3167_v48  ;;  %2250 = vmatpush3.msra.mxu1 %v3284_v1 }
 0x655   :  { %1595 = vmatprep.subr.mxu0 %v3171_v34  ;;  %2251 = vmatprep.subr.mxu1 %v3480_v42 }
 0x656   :  { %1596 = vmatpush1.msra.mxu0 %v3175_v56  ;;  %2252 = vmatpush3.msra.mxu1 %v3290_v2  ;;  %v3526_v2 = vld [vmem:[#allocation39_spill] sm:$0xff] }
 0x657   :  { %1597 = vmatprep.subr.mxu0 %v3179_v35  ;;  %2253 = vmatprep.subr.mxu1 %v3480_v42 }
 0x658   :  { %1598 = vmatpush1.msra.mxu0 %v3183_v9  ;;  %2254 = vmatpush3.msra.mxu1 %v3296_v51 }
 0x659   :  { %1599 = vmatprep.subr.mxu0 %v3187_v36  ;;  %2255 = vmatprep.subr.mxu1 %v3480_v42 }
 0x65a   :  { %1600 = vmatpush1.msra.mxu0 %v3191_v47  ;;  %2256 = vmatpush3.msra.mxu1 %v3302_v4  ;;  %v3524_v47 = vld [vmem:[#allocation33_spill] sm:$0xff] }
 0x65b   :  { %1601 = vmatprep.subr.mxu0 %v3195_v37  ;;  %2257 = vmatprep.subr.mxu1 %v3480_v42  ;;  %v3527_v4 = vld [vmem:[#allocation41_spill] sm:$0xff] }
 0x65c   :  { %1602 = vmatpush1.msra.mxu0 %v3199_v49  ;;  %2258 = vmatpush3.msra.mxu1 %v3517_v25  ;;  %v581_v6 = vmax.f32 %v3527_v4, -3.4028235e+38  ;;  %v747_v19 = vadd.f32 %v3528_v7, %v3527_v4 }
 0x65d   :  { %1603 = vmatprep.subr.mxu0 %v3518_v60  ;;  %2259 = vmatprep.subr.mxu1 %v3480_v42 }
 0x65e   :  { %1604 = vmatpush1.msra.mxu0 %v3519_v40  ;;  %1637 = vmatprep.mubr.f32.mxu0 %v3480_v42  ;;  %v746_v10 = vmax.f32 %v581_v6, %v3528_v7  ;;  %v912_v8 = vadd.f32 %v3529_v20, %v747_v19 }
 0x65f   :  { %2260 = vmatpush3.msra.mxu1 %v3520_v54  ;;  %2261 = vmatprep.mubr.msk.f32.mxu1 %vm2497_vm0, %v3480_v42  ;;  %v2402_v42 = vld [vmem:[%s3425_s4] ss:$0 sm:$0xff]  ;;  %s2498_s4 = smov [#allocation11]  }
 0x660   :  { %v911_v52 = vmax.f32 %v746_v10, %v3529_v20  ;;  %v1077_v15 = vadd.f32 %v3530_v13, %v912_v8  ;;  %s1753_s14 = sshll.u32 %s2498_s4, 4  ;;  %s1754_s14 = int_to_ptr.vmem [resolvable:$true] %s1753_s14 }
 0x661   :  { %s2463_s15 = scalar_lea.vmem %s1754_s14, 256  ;;  %p2468_p2 = scmp.lt.s32.totalorder %s1754_s14, %s1754_s14 }
 0x662   :  { %v1076_v14 = vmax.f32 %v911_v52, %v3530_v13  ;;  %v1242_v25 = vadd.f32 %v3221_v21, %v1077_v15  ;;  %p2464_p1 = scmp.ne.s32.totalorder %s1754_s14, %s2463_s15  ;;  %p2469_p3 = scmp.lt.s32.totalorder %s2463_s15, %s2463_s15 }
 0x664   :  { %v1241_v17 = vmax.f32 %v1076_v14, %v3221_v21  ;;  %p2470_p4 = por %p2469_p3, %p2468_p2 }
 0x666   :  { %v1406_v54 = vmax.f32 %v1241_v17, %v3327_v18  ;;  %p2471_p5 = pnand %p2470_p4, %p2464_p1 }
 0x6ff   :  { %v1474_v16 = vpop.f32.mrf.mxu0  ;;  %v1545_v44 = vpop.f32.mrf.mxu1 }
 0x700   :  { %v1549_v26 = vadd.f32 %v1474_v16, %v3521_v0  ;;  %v1563_v30 = vadd.f32 %v2402_v42, %v1545_v44  ;;  %v1407_v16 = vadd.f32 %v3327_v18, %v1242_v25 }
 0x701   :  { %v2228_v5 = vpop.f32.mrf.mxu1  ;;  %v1476_v50 = vpop.f32.mrf.mxu0 }
 0x702   :  { %v1776_v3 = vmul.f32 -1.442695, %v1549_v26  ;;  %v1556_v27 = vadd.f32 %v1476_v50, %v3522_v43 }
 0x704   :  { %2334 = vpow2.f32 %v1776_v3  ;;  %v1777_v22 = vmul.f32 -1.442695, %v1556_v27 }
 0x706   :  { %2336 = vpow2.f32 %v1777_v22 }
 0x711   :  { %v2335_v28 = vpop.eup %2334 }
 0x712   :  { %v1553_v11 = vadd.f32 1.0, %v2335_v28 }
 0x713   :  { %v2337_v29 = vpop.eup %2336 }
 0x714   :  { %2338 = vrcp.f32 %v1553_v11  ;;  %v1560_v62 = vadd.f32 1.0, %v2337_v29 }
 0x716   :  { %2340 = vrcp.f32 %v1560_v62 }
 0x721   :  { %v2339_v24 = vpop.eup %2338 }
 0x722   :  { %v1564_v31 = vmul.f32 %v2339_v24, %v1563_v30 }
 0x723   :  { %v2341_v41 = vpop.eup %2340 }
 0x724   :  { %v1565_v32 = vadd.f32 %v1564_v31, %v3523_v45  ;;  %v1567_v33 = vsub.f32 1.0, %v2341_v41  ;;  %v1569_v56 = vmul.f32 %v2341_v41, %v3327_v18 }
 0x726   :  { %2342 = vtanh.f32 %v1565_v32 }
 0x733   :  { %v2343_v48 = vpop.eup %2342 }
 0x734   :  { %v1568_v34 = vmul.f32 %v2343_v48, %v1567_v33 }
 0x736   :  { %v1570_v35 = vadd.f32 %v1569_v56, %v1568_v34 }
 0x738   :  { %1638 = vmatmul.mubr.f32.vlgmr.msra.gmra.mxu0 %v1570_v35  ;;  %2262 = vmatmul.mubr.f32.vlgmr.msra.gmra.mxu1 %v1570_v35  ;;  %v1571_v26 = vmax.f32 %v1406_v54, %v1570_v35  ;;  %v1572_v5 = vadd.f32 %v1570_v35, %v1407_v16 }
 0x7f8   :  { %v1639_v9 = vpop.f32.mrf.mxu0  ;;  %v1710_v36 = vpop.f32.mrf.mxu1 }
 0x7f9   :  { %v1714_v37 = vadd.f32 %v1639_v9, %v3524_v47  ;;  %v1728_v61 = vadd.f32 %v2402_v42, %v1710_v36 }
 0x7fa   :  { %v2263_v49 = vpop.f32.mrf.mxu1  ;;  %v1641_v53 = vpop.f32.mrf.mxu0 }
 0x7fb   :  { %v1778_v38 = vmul.f32 -1.442695, %v1714_v37  ;;  %v1721_v39 = vadd.f32 %v1641_v53, %v3525_v23 }
 0x7fd   :  { %2344 = vpow2.f32 %v1778_v38  ;;  %v1779_v46 = vmul.f32 -1.442695, %v1721_v39 }
 0x7ff   :  { %2346 = vpow2.f32 %v1779_v46 }
 0x80a   :  { %v2345_v55 = vpop.eup %2344 }
 0x80b   :  { %v1718_v57 = vadd.f32 1.0, %v2345_v55 }
 0x80c   :  { %v2347_v58 = vpop.eup %2346 }
 0x80d   :  { %2348 = vrcp.f32 %v1718_v57  ;;  %v1725_v59 = vadd.f32 1.0, %v2347_v58 }
 0x80f   :  { %2350 = vrcp.f32 %v1725_v59 }
 0x81a   :  { %v2349_v63 = vpop.eup %2348 }
 0x81b   :  { %v1729_v1 = vmul.f32 %v2349_v63, %v1728_v61 }
 0x81c   :  { %v2351_v12 = vpop.eup %2350 }
 0x81d   :  { %v1730_v51 = vadd.f32 %v1729_v1, %v3526_v2  ;;  %v1732_v60 = vsub.f32 1.0, %v2351_v12  ;;  %v1734_v0 = vmul.f32 %v2351_v12, %v1570_v35 }
 0x81f   :  { %2352 = vtanh.f32 %v1730_v51 }
 0x82c   :  { %v2353_v40 = vpop.eup %2352 }
 0x82d   :  { %v1733_v44 = vmul.f32 %v2353_v40, %v1732_v60 }
 0x82f   :  { %v1735_v3 = vadd.f32 %v1734_v0, %v1733_v44 }
 0x831   :  { %v1736_v50 = vmax.f32 %v1571_v26, %v1735_v3  ;;  %v1737_v43 = vadd.f32 %v1735_v3, %v1572_v5 }
 0x833   :  { %1744 = vst [vmem:[#allocation11] sm:$0xff] %v1736_v50  ;;  %v1745_v27 = vmul.f32 0.125, %v1737_v43 }
 0x835   :  { %1746 = vst [vmem:[#allocation11 + $0x8] sm:$0xff] %v1745_v27 }
 0x836   :  { %2474 = shalt.err (!%p2471_p5)
}
 0x837   :  { %1756 = dma.vmem_to_hbm [thread:$0]  %s1754_s14, 256, %s3426_s5, [#allocation7]  }
 0x838   :  { %2487 = dma.done.wait [#allocation7], 256  }
 0x839   :  { %2488 = vsyncadd [#allocation7], 4294967040 }
 0x83a   :  { %1760 = vsyncpa [#allocation6], 1 }
 0x83b   :  { %1761 = vsyncpa [#allocation9], 1 }
 0x83c   :  { %1762 = vsyncpa [#allocation7], 1 }

</bundles_post_ra>
